<compile_context>
chip_gen: v7x
topology: tpu7x:2x2x1
jax: 0.10.0
libtpu: 0.0.40
codegen_flags: <defaults>
</compile_context>

<pallas_src>
import functools

import numpy as np
import jax
import jax.numpy as jnp
from jax import lax
from jax.experimental import pallas as pl
from jax.experimental.pallas import tpu as pltpu


# --------------------------------- kernel ----------------------------------
def _resblock_kernel(Nb, H, W, Cin, Cmid, eps,
                     x_ref, w1_ref, w2_ref, aff_ref, red_ref, bcast_ref,
                     ssum_ref, sbc_ref, o_ref):
    """Processes Nb batch samples per grid step; activations flat (Nb*H, W*C)."""
    M = Nb * H
    WCin = W * Cin
    WCout = W * Cmid

    # Row-within-sample masks for the dy = -1 / +1 contributions (tiny (M,1) iota).
    row = lax.broadcasted_iota(jnp.int32, (M, 1), 0) % H
    mtop = (row > 0).astype(jnp.float32)       # row h-1 exists inside this sample
    mbot = (row < H - 1).astype(jnp.float32)   # row h+1 exists inside this sample

    Ssum = ssum_ref[...]      # (Np, M)     per-sample row-sum selector
    Sbc = sbc_ref[...]        # (M, Np)     per-sample row broadcast
    Red = red_ref[...]        # (WCout, Gp) column -> group reduce (scaled 1/(H*W*Cg))
    Bc = bcast_ref[...]       # (Gp, WCout) group -> column broadcast

    def group_mean(mat):      # (M, WCout) f32 -> per-(sample, group) mean, broadcast back
        g = jnp.dot(jnp.dot(Ssum, mat, preferred_element_type=jnp.float32), Red,
                    preferred_element_type=jnp.float32)                  # (Np, Gp)
        return jnp.dot(jnp.dot(Sbc, g, preferred_element_type=jnp.float32), Bc,
                       preferred_element_type=jnp.float32)               # (M, WCout)

    def conv_gn_relu(xs_bf16, w_ref, bias, gamma, beta):
        # 3x3 conv = 3 banded, lane-dense MXU matmuls (one per dy); dx is folded into
        # the block-banded weights so width padding is implicit and slabs start at
        # lane 0.  H padding handled by sublane roll + per-sample row masks.
        y0 = jnp.dot(xs_bf16, w_ref[0], preferred_element_type=jnp.float32)  # dy = -1
        y1 = jnp.dot(xs_bf16, w_ref[1], preferred_element_type=jnp.float32)  # dy =  0
        y2 = jnp.dot(xs_bf16, w_ref[2], preferred_element_type=jnp.float32)  # dy = +1
        acc = (y1
               + mtop * pltpu.roll(y0, 1, 0)        # acc[r] += y0[r-1]
               + mbot * pltpu.roll(y2, M - 1, 0)    # acc[r] += y2[r+1]
               + bias)

        # GroupNorm, two-pass (mean, then centered sum of squares), f32 throughout.
        mean = group_mean(acc)
        cen = acc - mean
        var = group_mean(cen * cen)
        inv = lax.rsqrt(var + eps)
        return jnp.maximum(cen * inv * gamma + beta, 0.0)                # ReLU

    b1 = aff_ref[0:1, :]; g1 = aff_ref[1:2, :]; bt1 = aff_ref[2:3, :]
    b2 = aff_ref[3:4, :]; g2 = aff_ref[4:5, :]; bt2 = aff_ref[5:6, :]

    x = x_ref[...].reshape(M, WCin)                  # residual stays resident in VMEM
    y = conv_gn_relu(x.astype(jnp.bfloat16), w1_ref, b1, g1, bt1)
    y = conv_gn_relu(y.astype(jnp.bfloat16), w2_ref, b2, g2, bt2)
    o_ref[...] = jnp.maximum(x + y, 0.0).reshape(Nb, H, WCout)           # relu(x + y)


# ----------------------------- wrapper helpers ------------------------------
def _band_weights(w_hwio, W):
    """Fold the 3 dx taps into block-banded (W*Cin, W*Cout) bf16 matrices, one per dy."""
    kh, kw, cin, cout = w_hwio.shape
    assert kh == 3 and kw == 3
    bands = []
    for dy in range(3):
        m = jnp.zeros((W, cin, W, cout), jnp.float32)
        for dx in range(3):
            win = np.arange(W)[:, None]
            wout = np.arange(W)[None, :]
            shift = jnp.asarray((win == wout + dx - 1).astype(np.float32))   # (W, W)
            m = m + jnp.einsum('ab,io->aibo', shift, w_hwio[dy, dx].astype(jnp.float32))
        bands.append(m.reshape(W * cin, W * cout))
    return jnp.stack(bands, 0).astype(jnp.bfloat16)          # (3, W*cin, W*cout)


def _group_norm_operators(H, W, C, G, Nb):
    """Skinny GroupNorm reduce/broadcast operators + per-sample row selectors."""
    Cg = C // G
    Gp = ((G + 127) // 128) * 128          # lane-dense group dimension
    Np = ((Nb + 7) // 8) * 8               # sublane-aligned sample dimension
    cols = np.arange(W * C)
    grp = (cols % C) // Cg
    red = np.zeros((W * C, Gp), np.float32)
    red[cols, grp] = 1.0 / float(H * W * Cg)
    bcast = np.zeros((Gp, W * C), np.float32)
    bcast[grp, cols] = 1.0
    M = Nb * H
    rows = np.arange(M)
    ssum = np.zeros((Np, M), np.float32)
    ssum[rows // H, rows] = 1.0
    sbc = np.ascontiguousarray(ssum.T)     # (M, Np)
    return (jnp.asarray(red), jnp.asarray(bcast), jnp.asarray(ssum), jnp.asarray(sbc))


# --------------------------------- wrapper ----------------------------------
def residual_block_forward_nhwc(x_nhwc, params, num_groups, eps=1e-5):
    """ResidualBlock.forward (norm_fn='group', stride=1). NHWC in / NHWC out."""
    N, H, W, Cin = x_nhwc.shape
    Cout = params["w1"].shape[-1]
    G = num_groups
    if Cin != Cout:
        raise NotImplementedError("stride=1 residual path requires in_planes == planes")
    if G < 1 or Cout % G != 0:
        raise ValueError("planes must be divisible by num_groups")
    if (W * Cin) % 128 != 0 or (W * Cout) % 128 != 0:
        raise ValueError("W*C must be a multiple of 128 for the lane-dense layout")

    # Batch block size: stack Nb samples along M so each MXU matmul sees ~128 rows.
    Nb = max(1, min(N, max(1, 128 // H))) if H % 8 == 0 else 1
    while N % Nb:
        Nb -= 1
    M = Nb * H
    WCin, WCout = W * Cin, W * Cout

    x_flat = x_nhwc.reshape(N, H, WCin).astype(jnp.float32)   # lane-dense flat layout

    w1b = _band_weights(params["w1"], W)                       # (3, WCin, WCout) bf16
    w2b = _band_weights(params["w2"], W)                       # (3, WCout, WCout) bf16

    def _row(v):
        return jnp.tile(v.astype(jnp.float32), W).reshape(1, WCout)
    aff = jnp.concatenate(
        [_row(params["b1"]), _row(params["g1"]), _row(params["beta1"]),
         _row(params["b2"]), _row(params["g2"]), _row(params["beta2"]),
         jnp.zeros((2, WCout), jnp.float32)], axis=0)          # (8, WCout)

    red, bcast, ssum, sbc = _group_norm_operators(H, W, Cout, G, Nb)
    Gp, Np = red.shape[1], ssum.shape[0]

    kernel = functools.partial(_resblock_kernel, Nb, H, W, Cin, Cout, eps)

    def _const(shape):   # grid-invariant 2-D operand
        return pl.BlockSpec(shape, lambda n: (0, 0))

    in_specs = [
        pl.BlockSpec((Nb, H, WCin), lambda n: (n, 0, 0)),
        pl.BlockSpec((3, WCin, WCout), lambda n: (0, 0, 0)),
        pl.BlockSpec((3, WCout, WCout), lambda n: (0, 0, 0)),
        _const((8, WCout)),
        _const((WCout, Gp)),
        _const((Gp, WCout)),
        _const((Np, M)),
        _const((M, Np)),
    ]
    out_specs = pl.BlockSpec((Nb, H, WCout), lambda n: (n, 0, 0))

    # Advisory cost estimate + VMEM budget from the actual working set.
    steps = N // Nb
    conv_flops = steps * 6 * M * (WCin * WCout + WCout * WCout)
    gn_flops = steps * 2 * 2 * 2 * (Np * M * WCout + Np * WCout * Gp
                                    + M * Np * Gp + M * Gp * WCout)
    flops = conv_flops + gn_flops + steps * 20 * M * WCout
    transc = steps * 2 * M * WCout
    bytes_accessed = (4 * (x_flat.size + N * H * WCout)
                      + 2 * (w1b.size + w2b.size)
                      + 4 * (aff.size + red.size + bcast.size + ssum.size + sbc.size))
    blk_bytes = 4 * (Nb * H * WCin + Nb * H * WCout)
    const_bytes = (2 * (w1b.size + w2b.size)
                   + 4 * (aff.size + red.size + bcast.size + ssum.size + sbc.size))
    vmem_est = 2 * (blk_bytes + const_bytes) + 16 * M * WCout * 4
    vmem_limit = int(min(64 * 2**20, max(16 * 2**20, 2 * vmem_est)))

    out_flat = pl.pallas_call(
        kernel,
        out_shape=jax.ShapeDtypeStruct((N, H, WCout), jnp.float32),
        grid=(steps,),
        in_specs=in_specs,
        out_specs=out_specs,
        compiler_params=pltpu.CompilerParams(
            dimension_semantics=("parallel",),
            vmem_limit_bytes=vmem_limit),
        cost_estimate=pl.CostEstimate(flops=int(flops),
                                      transcendentals=int(transc),
                                      bytes_accessed=int(bytes_accessed)),
    )(x_flat, w1b, w2b, aff, red, bcast, ssum, sbc)

    return out_flat.reshape(N, H, W, Cout)


def residual_block_forward(x_nchw, params, num_groups, eps=1e-5):
    """NCHW adapter mirroring the PyTorch interface (prefer the NHWC entry point)."""
    x = jnp.transpose(x_nchw, (0, 2, 3, 1))                  # NCHW -> NHWC
    out = residual_block_forward_nhwc(x, params, num_groups, eps)
    return jnp.transpose(out, (0, 3, 1, 2))                  # NHWC -> NCHW


# -------------------- pure-JAX reference for correctness --------------------
def _ref_conv_gn_relu(x, w, b, gamma, beta, G, eps):
    # bf16 conv operands with f32 accumulation, mirroring the kernel's MXU precision.
    y = lax.conv_general_dilated(
        x.astype(jnp.bfloat16), w.astype(jnp.bfloat16),
        window_strides=(1, 1), padding="SAME",
        dimension_numbers=("NHWC", "HWIO", "NHWC"),
        preferred_element_type=jnp.float32)
    y = y + b.reshape(1, 1, 1, -1).astype(jnp.float32)
    N, H, W, C = y.shape
    yg = y.reshape(N, H, W, G, C // G)
    mean = jnp.mean(yg, axis=(1, 2, 4), keepdims=True)
    var = jnp.mean(jnp.square(yg - mean), axis=(1, 2, 4), keepdims=True)
    yn = ((yg - mean) * lax.rsqrt(var + eps)).reshape(N, H, W, C)
    return jnp.maximum(yn * gamma.reshape(1, 1, 1, -1) + beta.reshape(1, 1, 1, -1), 0.0)


def _ref_forward(x_nchw, params, G, eps=1e-5):
    x = jnp.transpose(x_nchw, (0, 2, 3, 1))
    y = _ref_conv_gn_relu(x, params["w1"], params["b1"], params["g1"], params["beta1"], G, eps)
    y = _ref_conv_gn_relu(y, params["w2"], params["b2"], params["g2"], params["beta2"], G, eps)
    out = jnp.maximum(x + y, 0.0)
    return jnp.transpose(out, (0, 3, 1, 2))


if __name__ == "__main__":
    def run_case(key, N, planes, H, W):
        num_groups = planes // 8                  # as in the module (norm_fn='group')
        ks = jax.random.split(key, 9)
        params = {
            "w1": 0.1 * jax.random.normal(ks[0], (3, 3, planes, planes), jnp.float32),
            "b1": 0.1 * jax.random.normal(ks[1], (planes,), jnp.float32),
            "g1": 1.0 + 0.1 * jax.random.normal(ks[2], (planes,), jnp.float32),
            "beta1": 0.1 * jax.random.normal(ks[3], (planes,), jnp.float32),
            "w2": 0.1 * jax.random.normal(ks[4], (3, 3, planes, planes), jnp.float32),
            "b2": 0.1 * jax.random.normal(ks[5], (planes,), jnp.float32),
            "g2": 1.0 + 0.1 * jax.random.normal(ks[6], (planes,), jnp.float32),
            "beta2": 0.1 * jax.random.normal(ks[7], (planes,), jnp.float32),
        }
        x = jax.random.normal(ks[8], (N, planes, H, W), jnp.float32)   # NCHW like PyTorch

        out = jax.block_until_ready(residual_block_forward(x, params, num_groups))
        ref = jax.block_until_ready(_ref_forward(x, params, num_groups))
        assert out.shape == (N, planes, H, W)
        err = float(jnp.max(jnp.abs(out - ref)))
        assert jnp.allclose(out, ref, atol=1e-2, rtol=1e-2), f"max abs diff {err}"

    key = jax.random.PRNGKey(0)
    k1, k2 = jax.random.split(key)
    run_case(k1, N=2, planes=8, H=16, W=16)    # num_groups=1, W*C = 128 (lane-dense)
    run_case(k2, N=2, planes=16, H=16, W=16)   # num_groups=2, W*C = 256

    print("KERNEL_OK")
</pallas_src>

<mosaic_0001>
module attributes {stable_mosaic.version = 11 : i64} {
  func.func @_resblock_kernel(%arg0: i32, %arg1: memref<2x16x128xf32, #tpu.memory_space<vmem>>, %arg2: memref<3x128x128xbf16, #tpu.memory_space<vmem>>, %arg3: memref<3x128x128xbf16, #tpu.memory_space<vmem>>, %arg4: memref<8x128xf32, #tpu.memory_space<vmem>>, %arg5: memref<128x128xf32, #tpu.memory_space<vmem>>, %arg6: memref<128x128xf32, #tpu.memory_space<vmem>>, %arg7: memref<8x32xf32, #tpu.memory_space<vmem>>, %arg8: memref<32x8xf32, #tpu.memory_space<vmem>>, %arg9: memref<2x16x128xf32, #tpu.memory_space<vmem>>) attributes {dimension_semantics = [#tpu.dimension_semantics<parallel>], iteration_bounds = array<i64: 1>, scalar_prefetch = 0 : i64, scratch_operands = 0 : i64, tpu.core_type = #tpu.core_type<tc>, window_params = [{transform_indices = @transform_0, window_bounds = array<i64: 2, 16, 128>}, {pipeline_mode = #tpu.pipeline_mode<synchronous>, transform_indices = @transform_1, window_bounds = array<i64: 3, 128, 128>}, {pipeline_mode = #tpu.pipeline_mode<synchronous>, transform_indices = @transform_2, window_bounds = array<i64: 3, 128, 128>}, {pipeline_mode = #tpu.pipeline_mode<synchronous>, transform_indices = @transform_3, window_bounds = array<i64: 8, 128>}, {pipeline_mode = #tpu.pipeline_mode<synchronous>, transform_indices = @transform_4, window_bounds = array<i64: 128, 128>}, {pipeline_mode = #tpu.pipeline_mode<synchronous>, transform_indices = @transform_5, window_bounds = array<i64: 128, 128>}, {pipeline_mode = #tpu.pipeline_mode<synchronous>, transform_indices = @transform_6, window_bounds = array<i64: 8, 32>}, {pipeline_mode = #tpu.pipeline_mode<synchronous>, transform_indices = @transform_7, window_bounds = array<i64: 32, 8>}, {transform_indices = @transform_8, window_bounds = array<i64: 2, 16, 128>}]} {
    %0 = tpu.iota {dimensions = array<i32: 0>} : vector<32x1xi32>
    %c16_i32 = arith.constant 16 : i32
    %c0_i32 = arith.constant 0 : i32
    %1 = arith.cmpi eq, %c16_i32, %c0_i32 : i32
    %c1_i32 = arith.constant 1 : i32
    %2 = arith.select %1, %c1_i32, %c16_i32 : i32
    %3 = vector.broadcast %2 : i32 to vector<32x1xi32>
    %4 = arith.remsi %0, %3 : vector<32x1xi32>
    %c0_i32_0 = arith.constant 0 : i32
    %5 = vector.broadcast %c0_i32_0 : i32 to vector<32x1xi32>
    %6 = arith.cmpi ne, %4, %5 : vector<32x1xi32>
    %c0_i32_1 = arith.constant 0 : i32
    %7 = vector.broadcast %c0_i32_1 : i32 to vector<32x1xi32>
    %8 = arith.cmpi slt, %4, %7 : vector<32x1xi32>
    %c0_i32_2 = arith.constant 0 : i32
    %9 = arith.cmpi slt, %2, %c0_i32_2 : i32
    %10 = vector.broadcast %9 : i1 to vector<32x1xi1>
    %11 = vector.broadcast %10 : vector<32x1xi1> to vector<32x1xi1>
    %12 = arith.xori %8, %11 : vector<32x1xi1>
    %13 = arith.andi %12, %6 : vector<32x1xi1>
    %14 = vector.broadcast %2 : i32 to vector<32x1xi32>
    %15 = arith.addi %4, %14 : vector<32x1xi32>
    %16 = arith.select %13, %15, %4 : vector<32x1xi1>, vector<32x1xi32>
    %c0_i32_3 = arith.constant 0 : i32
    %17 = vector.broadcast %c0_i32_3 : i32 to vector<32x1xi32>
    %18 = arith.cmpi sgt, %16, %17 : vector<32x1xi32>
    %19 = arith.extui %18 : vector<32x1xi1> to vector<32x1xi32>
    %20 = arith.sitofp %19 : vector<32x1xi32> to vector<32x1xf32>
    %c15_i32 = arith.constant 15 : i32
    %21 = vector.broadcast %c15_i32 : i32 to vector<32x1xi32>
    %22 = arith.cmpi slt, %16, %21 : vector<32x1xi32>
    %23 = arith.extui %22 : vector<32x1xi1> to vector<32x1xi32>
    %24 = arith.sitofp %23 : vector<32x1xi32> to vector<32x1xf32>
    %c0 = arith.constant 0 : index
    %c0_4 = arith.constant 0 : index
    %25 = vector.load %arg7[%c0, %c0_4] : memref<8x32xf32, #tpu.memory_space<vmem>>, vector<8x32xf32>
    %c0_5 = arith.constant 0 : index
    %c0_6 = arith.constant 0 : index
    %26 = vector.load %arg8[%c0_5, %c0_6] : memref<32x8xf32, #tpu.memory_space<vmem>>, vector<32x8xf32>
    %c0_7 = arith.constant 0 : index
    %c0_8 = arith.constant 0 : index
    %27 = vector.load %arg5[%c0_7, %c0_8] : memref<128x128xf32, #tpu.memory_space<vmem>>, vector<128x128xf32>
    %c0_9 = arith.constant 0 : index
    %c0_10 = arith.constant 0 : index
    %28 = vector.load %arg6[%c0_9, %c0_10] : memref<128x128xf32, #tpu.memory_space<vmem>>, vector<128x128xf32>
    %c0_11 = arith.constant 0 : index
    %c0_12 = arith.constant 0 : index
    %29 = vector.load %arg4[%c0_11, %c0_12] : memref<8x128xf32, #tpu.memory_space<vmem>>, vector<1x128xf32>
    %c1 = arith.constant 1 : index
    %c0_13 = arith.constant 0 : index
    %30 = vector.load %arg4[%c1, %c0_13] : memref<8x128xf32, #tpu.memory_space<vmem>>, vector<1x128xf32>
    %c2 = arith.constant 2 : index
    %c0_14 = arith.constant 0 : index
    %31 = vector.load %arg4[%c2, %c0_14] : memref<8x128xf32, #tpu.memory_space<vmem>>, vector<1x128xf32>
    %c3 = arith.constant 3 : index
    %c0_15 = arith.constant 0 : index
    %32 = vector.load %arg4[%c3, %c0_15] : memref<8x128xf32, #tpu.memory_space<vmem>>, vector<1x128xf32>
    %c4 = arith.constant 4 : index
    %c0_16 = arith.constant 0 : index
    %33 = vector.load %arg4[%c4, %c0_16] : memref<8x128xf32, #tpu.memory_space<vmem>>, vector<1x128xf32>
    %c5 = arith.constant 5 : index
    %c0_17 = arith.constant 0 : index
    %34 = vector.load %arg4[%c5, %c0_17] : memref<8x128xf32, #tpu.memory_space<vmem>>, vector<1x128xf32>
    %c0_18 = arith.constant 0 : index
    %c0_19 = arith.constant 0 : index
    %c0_20 = arith.constant 0 : index
    %35 = vector.load %arg1[%c0_18, %c0_19, %c0_20] : memref<2x16x128xf32, #tpu.memory_space<vmem>>, vector<2x16x128xf32>
    %36 = vector.shape_cast %35 : vector<2x16x128xf32> to vector<32x128xf32>
    %37 = arith.truncf %36 : vector<32x128xf32> to vector<32x128xbf16>
    %c0_21 = arith.constant 0 : index
    %c0_22 = arith.constant 0 : index
    %c0_23 = arith.constant 0 : index
    %38 = vector.load %arg2[%c0_21, %c0_22, %c0_23] : memref<3x128x128xbf16, #tpu.memory_space<vmem>>, vector<1x128x128xbf16>
    %39 = vector.shape_cast %38 : vector<1x128x128xbf16> to vector<128x128xbf16>
    %cst = arith.constant dense<0.000000e+00> : vector<32x128xf32>
    %40 = tpu.matmul %37, %39, %cst {dimension_numbers = #tpu.dot_dimension_numbers<[1], [0], [0], [1], [0, 0, 1, 1], [], []>} : vector<32x128xbf16>, vector<128x128xbf16>, vector<32x128xf32> -> vector<32x128xf32>
    %c1_24 = arith.constant 1 : index
    %c0_25 = arith.constant 0 : index
    %c0_26 = arith.constant 0 : index
    %41 = vector.load %arg2[%c1_24, %c0_25, %c0_26] : memref<3x128x128xbf16, #tpu.memory_space<vmem>>, vector<1x128x128xbf16>
    %42 = vector.shape_cast %41 : vector<1x128x128xbf16> to vector<128x128xbf16>
    %cst_27 = arith.constant dense<0.000000e+00> : vector<32x128xf32>
    %43 = tpu.matmul %37, %42, %cst_27 {dimension_numbers = #tpu.dot_dimension_numbers<[1], [0], [0], [1], [0, 0, 1, 1], [], []>} : vector<32x128xbf16>, vector<128x128xbf16>, vector<32x128xf32> -> vector<32x128xf32>
    %c2_28 = arith.constant 2 : index
    %c0_29 = arith.constant 0 : index
    %c0_30 = arith.constant 0 : index
    %44 = vector.load %arg2[%c2_28, %c0_29, %c0_30] : memref<3x128x128xbf16, #tpu.memory_space<vmem>>, vector<1x128x128xbf16>
    %45 = vector.shape_cast %44 : vector<1x128x128xbf16> to vector<128x128xbf16>
    %cst_31 = arith.constant dense<0.000000e+00> : vector<32x128xf32>
    %46 = tpu.matmul %37, %45, %cst_31 {dimension_numbers = #tpu.dot_dimension_numbers<[1], [0], [0], [1], [0, 0, 1, 1], [], []>} : vector<32x128xbf16>, vector<128x128xbf16>, vector<32x128xf32> -> vector<32x128xf32>
    %c1_i32_32 = arith.constant 1 : i32
    %47 = tpu.dynamic_rotate %40 by %c1_i32_32 dim 0 : vector<32x128xf32>, i32 -> vector<32x128xf32>
    %48 = vector.broadcast %20 : vector<32x1xf32> to vector<32x128xf32>
    %49 = arith.mulf %48, %47 : vector<32x128xf32>
    %50 = arith.addf %43, %49 : vector<32x128xf32>
    %c31_i32 = arith.constant 31 : i32
    %51 = tpu.dynamic_rotate %46 by %c31_i32 dim 0 : vector<32x128xf32>, i32 -> vector<32x128xf32>
    %52 = vector.broadcast %24 : vector<32x1xf32> to vector<32x128xf32>
    %53 = arith.mulf %52, %51 : vector<32x128xf32>
    %54 = arith.addf %50, %53 : vector<32x128xf32>
    %55 = vector.broadcast %29 : vector<1x128xf32> to vector<32x128xf32>
    %56 = arith.addf %54, %55 : vector<32x128xf32>
    %cst_33 = arith.constant dense<0.000000e+00> : vector<8x128xf32>
    %57 = tpu.matmul %25, %56, %cst_33 {dimension_numbers = #tpu.dot_dimension_numbers<[1], [0], [0], [1], [0, 0, 1, 1], [], []>} : vector<8x32xf32>, vector<32x128xf32>, vector<8x128xf32> -> vector<8x128xf32>
    %cst_34 = arith.constant dense<0.000000e+00> : vector<8x128xf32>
    %58 = tpu.matmul %57, %27, %cst_34 {dimension_numbers = #tpu.dot_dimension_numbers<[1], [0], [0], [1], [0, 0, 1, 1], [], []>} : vector<8x128xf32>, vector<128x128xf32>, vector<8x128xf32> -> vector<8x128xf32>
    %cst_35 = arith.constant dense<0.000000e+00> : vector<32x128xf32>
    %59 = tpu.matmul %26, %58, %cst_35 {dimension_numbers = #tpu.dot_dimension_numbers<[1], [0], [0], [1], [0, 0, 1, 1], [], []>} : vector<32x8xf32>, vector<8x128xf32>, vector<32x128xf32> -> vector<32x128xf32>
    %cst_36 = arith.constant dense<0.000000e+00> : vector<32x128xf32>
    %60 = tpu.matmul %59, %28, %cst_36 {dimension_numbers = #tpu.dot_dimension_numbers<[1], [0], [0], [1], [0, 0, 1, 1], [], []>} : vector<32x128xf32>, vector<128x128xf32>, vector<32x128xf32> -> vector<32x128xf32>
    %61 = arith.subf %56, %60 : vector<32x128xf32>
    %62 = arith.mulf %61, %61 : vector<32x128xf32>
    %cst_37 = arith.constant dense<0.000000e+00> : vector<8x128xf32>
    %63 = tpu.matmul %25, %62, %cst_37 {dimension_numbers = #tpu.dot_dimension_numbers<[1], [0], [0], [1], [0, 0, 1, 1], [], []>} : vector<8x32xf32>, vector<32x128xf32>, vector<8x128xf32> -> vector<8x128xf32>
    %cst_38 = arith.constant dense<0.000000e+00> : vector<8x128xf32>
    %64 = tpu.matmul %63, %27, %cst_38 {dimension_numbers = #tpu.dot_dimension_numbers<[1], [0], [0], [1], [0, 0, 1, 1], [], []>} : vector<8x128xf32>, vector<128x128xf32>, vector<8x128xf32> -> vector<8x128xf32>
    %cst_39 = arith.constant dense<0.000000e+00> : vector<32x128xf32>
    %65 = tpu.matmul %26, %64, %cst_39 {dimension_numbers = #tpu.dot_dimension_numbers<[1], [0], [0], [1], [0, 0, 1, 1], [], []>} : vector<32x8xf32>, vector<8x128xf32>, vector<32x128xf32> -> vector<32x128xf32>
    %cst_40 = arith.constant dense<0.000000e+00> : vector<32x128xf32>
    %66 = tpu.matmul %65, %28, %cst_40 {dimension_numbers = #tpu.dot_dimension_numbers<[1], [0], [0], [1], [0, 0, 1, 1], [], []>} : vector<32x128xf32>, vector<128x128xf32>, vector<32x128xf32> -> vector<32x128xf32>
    %cst_41 = arith.constant 9.99999974E-6 : f32
    %67 = vector.broadcast %cst_41 : f32 to vector<32x128xf32>
    %68 = arith.addf %66, %67 : vector<32x128xf32>
    %69 = math.rsqrt %68 : vector<32x128xf32>
    %70 = arith.mulf %61, %69 : vector<32x128xf32>
    %71 = vector.broadcast %30 : vector<1x128xf32> to vector<32x128xf32>
    %72 = arith.mulf %70, %71 : vector<32x128xf32>
    %73 = vector.broadcast %31 : vector<1x128xf32> to vector<32x128xf32>
    %74 = arith.addf %72, %73 : vector<32x128xf32>
    %cst_42 = arith.constant 0.000000e+00 : f32
    %75 = vector.broadcast %cst_42 : f32 to vector<32x128xf32>
    %76 = arith.maximumf %74, %75 : vector<32x128xf32>
    %77 = arith.truncf %76 : vector<32x128xf32> to vector<32x128xbf16>
    %c0_43 = arith.constant 0 : index
    %c0_44 = arith.constant 0 : index
    %c0_45 = arith.constant 0 : index
    %78 = vector.load %arg3[%c0_43, %c0_44, %c0_45] : memref<3x128x128xbf16, #tpu.memory_space<vmem>>, vector<1x128x128xbf16>
    %79 = vector.shape_cast %78 : vector<1x128x128xbf16> to vector<128x128xbf16>
    %cst_46 = arith.constant dense<0.000000e+00> : vector<32x128xf32>
    %80 = tpu.matmul %77, %79, %cst_46 {dimension_numbers = #tpu.dot_dimension_numbers<[1], [0], [0], [1], [0, 0, 1, 1], [], []>} : vector<32x128xbf16>, vector<128x128xbf16>, vector<32x128xf32> -> vector<32x128xf32>
    %c1_47 = arith.constant 1 : index
    %c0_48 = arith.constant 0 : index
    %c0_49 = arith.constant 0 : index
    %81 = vector.load %arg3[%c1_47, %c0_48, %c0_49] : memref<3x128x128xbf16, #tpu.memory_space<vmem>>, vector<1x128x128xbf16>
    %82 = vector.shape_cast %81 : vector<1x128x128xbf16> to vector<128x128xbf16>
    %cst_50 = arith.constant dense<0.000000e+00> : vector<32x128xf32>
    %83 = tpu.matmul %77, %82, %cst_50 {dimension_numbers = #tpu.dot_dimension_numbers<[1], [0], [0], [1], [0, 0, 1, 1], [], []>} : vector<32x128xbf16>, vector<128x128xbf16>, vector<32x128xf32> -> vector<32x128xf32>
    %c2_51 = arith.constant 2 : index
    %c0_52 = arith.constant 0 : index
    %c0_53 = arith.constant 0 : index
    %84 = vector.load %arg3[%c2_51, %c0_52, %c0_53] : memref<3x128x128xbf16, #tpu.memory_space<vmem>>, vector<1x128x128xbf16>
    %85 = vector.shape_cast %84 : vector<1x128x128xbf16> to vector<128x128xbf16>
    %cst_54 = arith.constant dense<0.000000e+00> : vector<32x128xf32>
    %86 = tpu.matmul %77, %85, %cst_54 {dimension_numbers = #tpu.dot_dimension_numbers<[1], [0], [0], [1], [0, 0, 1, 1], [], []>} : vector<32x128xbf16>, vector<128x128xbf16>, vector<32x128xf32> -> vector<32x128xf32>
    %c1_i32_55 = arith.constant 1 : i32
    %87 = tpu.dynamic_rotate %80 by %c1_i32_55 dim 0 : vector<32x128xf32>, i32 -> vector<32x128xf32>
    %88 = vector.broadcast %20 : vector<32x1xf32> to vector<32x128xf32>
    %89 = arith.mulf %88, %87 : vector<32x128xf32>
    %90 = arith.addf %83, %89 : vector<32x128xf32>
    %c31_i32_56 = arith.constant 31 : i32
    %91 = tpu.dynamic_rotate %86 by %c31_i32_56 dim 0 : vector<32x128xf32>, i32 -> vector<32x128xf32>
    %92 = vector.broadcast %24 : vector<32x1xf32> to vector<32x128xf32>
    %93 = arith.mulf %92, %91 : vector<32x128xf32>
    %94 = arith.addf %90, %93 : vector<32x128xf32>
    %95 = vector.broadcast %32 : vector<1x128xf32> to vector<32x128xf32>
    %96 = arith.addf %94, %95 : vector<32x128xf32>
    %cst_57 = arith.constant dense<0.000000e+00> : vector<8x128xf32>
    %97 = tpu.matmul %25, %96, %cst_57 {dimension_numbers = #tpu.dot_dimension_numbers<[1], [0], [0], [1], [0, 0, 1, 1], [], []>} : vector<8x32xf32>, vector<32x128xf32>, vector<8x128xf32> -> vector<8x128xf32>
    %cst_58 = arith.constant dense<0.000000e+00> : vector<8x128xf32>
    %98 = tpu.matmul %97, %27, %cst_58 {dimension_numbers = #tpu.dot_dimension_numbers<[1], [0], [0], [1], [0, 0, 1, 1], [], []>} : vector<8x128xf32>, vector<128x128xf32>, vector<8x128xf32> -> vector<8x128xf32>
    %cst_59 = arith.constant dense<0.000000e+00> : vector<32x128xf32>
    %99 = tpu.matmul %26, %98, %cst_59 {dimension_numbers = #tpu.dot_dimension_numbers<[1], [0], [0], [1], [0, 0, 1, 1], [], []>} : vector<32x8xf32>, vector<8x128xf32>, vector<32x128xf32> -> vector<32x128xf32>
    %cst_60 = arith.constant dense<0.000000e+00> : vector<32x128xf32>
    %100 = tpu.matmul %99, %28, %cst_60 {dimension_numbers = #tpu.dot_dimension_numbers<[1], [0], [0], [1], [0, 0, 1, 1], [], []>} : vector<32x128xf32>, vector<128x128xf32>, vector<32x128xf32> -> vector<32x128xf32>
    %101 = arith.subf %96, %100 : vector<32x128xf32>
    %102 = arith.mulf %101, %101 : vector<32x128xf32>
    %cst_61 = arith.constant dense<0.000000e+00> : vector<8x128xf32>
    %103 = tpu.matmul %25, %102, %cst_61 {dimension_numbers = #tpu.dot_dimension_numbers<[1], [0], [0], [1], [0, 0, 1, 1], [], []>} : vector<8x32xf32>, vector<32x128xf32>, vector<8x128xf32> -> vector<8x128xf32>
    %cst_62 = arith.constant dense<0.000000e+00> : vector<8x128xf32>
    %104 = tpu.matmul %103, %27, %cst_62 {dimension_numbers = #tpu.dot_dimension_numbers<[1], [0], [0], [1], [0, 0, 1, 1], [], []>} : vector<8x128xf32>, vector<128x128xf32>, vector<8x128xf32> -> vector<8x128xf32>
    %cst_63 = arith.constant dense<0.000000e+00> : vector<32x128xf32>
    %105 = tpu.matmul %26, %104, %cst_63 {dimension_numbers = #tpu.dot_dimension_numbers<[1], [0], [0], [1], [0, 0, 1, 1], [], []>} : vector<32x8xf32>, vector<8x128xf32>, vector<32x128xf32> -> vector<32x128xf32>
    %cst_64 = arith.constant dense<0.000000e+00> : vector<32x128xf32>
    %106 = tpu.matmul %105, %28, %cst_64 {dimension_numbers = #tpu.dot_dimension_numbers<[1], [0], [0], [1], [0, 0, 1, 1], [], []>} : vector<32x128xf32>, vector<128x128xf32>, vector<32x128xf32> -> vector<32x128xf32>
    %cst_65 = arith.constant 9.99999974E-6 : f32
    %107 = vector.broadcast %cst_65 : f32 to vector<32x128xf32>
    %108 = arith.addf %106, %107 : vector<32x128xf32>
    %109 = math.rsqrt %108 : vector<32x128xf32>
    %110 = arith.mulf %101, %109 : vector<32x128xf32>
    %111 = vector.broadcast %33 : vector<1x128xf32> to vector<32x128xf32>
    %112 = arith.mulf %110, %111 : vector<32x128xf32>
    %113 = vector.broadcast %34 : vector<1x128xf32> to vector<32x128xf32>
    %114 = arith.addf %112, %113 : vector<32x128xf32>
    %cst_66 = arith.constant 0.000000e+00 : f32
    %115 = vector.broadcast %cst_66 : f32 to vector<32x128xf32>
    %116 = arith.maximumf %114, %115 : vector<32x128xf32>
    %117 = arith.addf %36, %116 : vector<32x128xf32>
    %cst_67 = arith.constant 0.000000e+00 : f32
    %118 = vector.broadcast %cst_67 : f32 to vector<32x128xf32>
    %119 = arith.maximumf %117, %118 : vector<32x128xf32>
    %120 = vector.shape_cast %119 : vector<32x128xf32> to vector<2x16x128xf32>
    %c0_68 = arith.constant 0 : index
    %c0_69 = arith.constant 0 : index
    %c0_70 = arith.constant 0 : index
    %121 = vector.load %arg9[%c0_68, %c0_69, %c0_70] : memref<2x16x128xf32, #tpu.memory_space<vmem>>, vector<2x16x128xf32>
    tpu.vector_store %arg9[%c0_68, %c0_69, %c0_70], %120 {strides = array<i32>} : memref<2x16x128xf32, #tpu.memory_space<vmem>>, vector<2x16x128xf32>,
    return
  }
  func.func @transform_0(%arg0: i32) -> (i32, i32, i32) {
    %c0_i32 = arith.constant 0 : i32
    %c0_i32_0 = arith.constant 0 : i32
    %c0_i32_1 = arith.constant 0 : i32
    return %arg0, %c0_i32, %c0_i32_0 : i32, i32, i32
  }
  func.func @transform_1(%arg0: i32) -> (i32, i32, i32) {
    %c0_i32 = arith.constant 0 : i32
    %c0_i32_0 = arith.constant 0 : i32
    %c0_i32_1 = arith.constant 0 : i32
    %c0_i32_2 = arith.constant 0 : i32
    return %c0_i32, %c0_i32_0, %c0_i32_1 : i32, i32, i32
  }
  func.func @transform_2(%arg0: i32) -> (i32, i32, i32) {
    %c0_i32 = arith.constant 0 : i32
    %c0_i32_0 = arith.constant 0 : i32
    %c0_i32_1 = arith.constant 0 : i32
    %c0_i32_2 = arith.constant 0 : i32
    return %c0_i32, %c0_i32_0, %c0_i32_1 : i32, i32, i32
  }
  func.func @transform_3(%arg0: i32) -> (i32, i32) {
    %c0_i32 = arith.constant 0 : i32
    %c0_i32_0 = arith.constant 0 : i32
    %c0_i32_1 = arith.constant 0 : i32
    return %c0_i32, %c0_i32_0 : i32, i32
  }
  func.func @transform_4(%arg0: i32) -> (i32, i32) {
    %c0_i32 = arith.constant 0 : i32
    %c0_i32_0 = arith.constant 0 : i32
    %c0_i32_1 = arith.constant 0 : i32
    return %c0_i32, %c0_i32_0 : i32, i32
  }
  func.func @transform_5(%arg0: i32) -> (i32, i32) {
    %c0_i32 = arith.constant 0 : i32
    %c0_i32_0 = arith.constant 0 : i32
    %c0_i32_1 = arith.constant 0 : i32
    return %c0_i32, %c0_i32_0 : i32, i32
  }
  func.func @transform_6(%arg0: i32) -> (i32, i32) {
    %c0_i32 = arith.constant 0 : i32
    %c0_i32_0 = arith.constant 0 : i32
    %c0_i32_1 = arith.constant 0 : i32
    return %c0_i32, %c0_i32_0 : i32, i32
  }
  func.func @transform_7(%arg0: i32) -> (i32, i32) {
    %c0_i32 = arith.constant 0 : i32
    %c0_i32_0 = arith.constant 0 : i32
    %c0_i32_1 = arith.constant 0 : i32
    return %c0_i32, %c0_i32_0 : i32, i32
  }
  func.func @transform_8(%arg0: i32) -> (i32, i32, i32) {
    %c0_i32 = arith.constant 0 : i32
    %c0_i32_0 = arith.constant 0 : i32
    %c0_i32_1 = arith.constant 0 : i32
    return %arg0, %c0_i32, %c0_i32_0 : i32, i32, i32
  }
}

</mosaic_0001>

<bundles_post_ra>
// kernel: tpu_custom_call.1
= control target key start
LH: loop header
LB: loop body
LE: loop exit
PB: predicated region body
PF: predicated region fallthrough
CT: control target
= control target key end

     0   :  { %13 = vsyncpa [#allocation3], 0  ;;  %s4130_s0 = inlined_call_operand.vmem [shape: f32[2,16,128], index: 0, kind: input, shape index: {}]   ;;  %s4131_s1 = inlined_call_operand.hbm [shape: bf16[3,128,128], index: 1, kind: input, shape index: {}]   ;;  %s4132_s2 = inlined_call_operand.hbm [shape: bf16[3,128,128], index: 2, kind: input, shape index: {}]   ;;  %s4133_s3 = inlined_call_operand.vmem [shape: f32[8,128], index: 3, kind: input, shape index: {}]   ;;  %s4134_s4 = inlined_call_operand.hbm [shape: f32[128,128], index: 4, kind: input, shape index: {}]   ;;  %s4135_s5 = inlined_call_operand.hbm [shape: f32[128,128], index: 5, kind: input, shape index: {}]   ;;  %s4136_s6 = inlined_call_operand.vmem [shape: f32[8,32], index: 6, kind: input, shape index: {}]   ;;  %s4137_s7 = inlined_call_operand.vmem [shape: f32[32,8], index: 7, kind: input, shape index: {}]   ;;  %s4138_s8 = inlined_call_operand.hbm [shape: f32[2,16,128], index: 8, kind: output, shape index: {}]  }
   0x1   :  { %14 = vsyncpa [#allocation6], 0 }
   0x2   :  { %15 = vsyncpa [#allocation9], 0 }
   0x3   :  { %16 = vsyncpa [#allocation4], 0  ;;  %s3590_s27 = smov [#allocation5]   ;;  %s3591_s29 = smov [#allocation2]  }
   0x4   :  { %s36_s28 = sshll.u32 %s3590_s27, 4  ;;  %s24_s30 = sshll.u32 %s3591_s29, 4  ;;  %s37_s28 = int_to_ptr.vmem [resolvable:$true] %s36_s28  ;;  %s3647_s30 = int_to_ptr.vmem [resolvable:$true] %s24_s30 }
   0x5   :  { %s3472_s11 = scalar_lea.hbm %s4132_s2, 3072 }
   0x6   :  { %p3473_p0 = scmp.ne.s32.totalorder %s4132_s2, %s3472_s11  ;;  %p3476_p1 = scmp.lt.u32.totalorder %s3472_s11, %s4132_s2 }
   0x8   :  { %p3478_p2 = pnand %p3476_p1, %p3473_p0 }
   0xa   :  { %3481 = shalt.err (!%p3478_p2)
}
   0xb   :  { %s3482_s16 = scalar_lea.vmem %s37_s28, 3072  ;;  %p3487_p4 = scmp.lt.s32.totalorder %s37_s28, %s37_s28 }
   0xc   :  { %p3483_p3 = scmp.ne.s32.totalorder %s37_s28, %s3482_s16  ;;  %p3488_p5 = scmp.lt.s32.totalorder %s3482_s16, %s3482_s16 }
   0xe   :  { %p3489_p6 = por %p3488_p5, %p3487_p4 }
  0x10   :  { %p3490_p7 = pnand %p3489_p6, %p3483_p3 }
  0x12   :  { %3493 = shalt.err (!%p3490_p7)
}
  0x13   :  { %s3592_s17 = smov 64   ;;  %s3593_s18 = smov 4  }
  0x14   :  { %42 = dma.hbm_to_vmem [thread:$0]  %s4132_s2, 3072, %s37_s28, [#allocation6], %s3592_s17, %s3592_s17, %s3593_s18  }
  0x15   :  { %s3494_s23 = scalar_lea.hbm %s4131_s1, 3072 }
  0x16   :  { %p3495_p8 = scmp.ne.s32.totalorder %s4131_s1, %s3494_s23  ;;  %p3498_p9 = scmp.lt.u32.totalorder %s3494_s23, %s4131_s1 }
  0x18   :  { %p3500_p10 = pnand %p3498_p9, %p3495_p8 }
  0x1a   :  { %3503 = shalt.err (!%p3500_p10)
}
  0x1b   :  { %s3504_s29 = scalar_lea.vmem %s3647_s30, 3072  ;;  %p3509_p12 = scmp.lt.s32.totalorder %s3647_s30, %s3647_s30 }
  0x1c   :  { %p3505_p11 = scmp.ne.s32.totalorder %s3647_s30, %s3504_s29  ;;  %p3510_p13 = scmp.lt.s32.totalorder %s3504_s29, %s3504_s29 }
  0x1e   :  { %p3511_p0 = por %p3510_p13, %p3509_p12 }
  0x20   :  { %p3512_p1 = pnand %p3511_p0, %p3505_p11 }
  0x22   :  { %3515 = shalt.err (!%p3512_p1)
}
  0x23   :  { %30 = dma.hbm_to_vmem [thread:$0]  %s4131_s1, 3072, %s3647_s30, [#allocation3], %s3592_s17, %s3592_s17, %s3593_s18  }
  0x24   :  { %s3594_s9 = smov [#allocation7]   ;;  %s3516_s13 = scalar_lea.hbm %s4134_s4, 2048 }
  0x25   :  { %s50_s10 = sshll.u32 %s3594_s9, 4  ;;  %p3517_p2 = scmp.ne.s32.totalorder %s4134_s4, %s3516_s13  ;;  %s51_s10 = int_to_ptr.vmem [resolvable:$true] %s50_s10 }
  0x26   :  { %p3520_p3 = scmp.lt.u32.totalorder %s3516_s13, %s4134_s4 }
  0x28   :  { %p3522_p4 = pnand %p3520_p3, %p3517_p2 }
  0x2a   :  { %3525 = shalt.err (!%p3522_p4)
}
  0x2b   :  { %s3526_s20 = scalar_lea.vmem %s51_s10, 2048  ;;  %p3531_p6 = scmp.lt.s32.totalorder %s51_s10, %s51_s10 }
  0x2c   :  { %p3527_p5 = scmp.ne.s32.totalorder %s51_s10, %s3526_s20  ;;  %p3532_p7 = scmp.lt.s32.totalorder %s3526_s20, %s3526_s20 }
  0x2e   :  { %p3533_p8 = por %p3532_p7, %p3531_p6 }
  0x30   :  { %p3534_p9 = pnand %p3533_p8, %p3527_p5 }
  0x32   :  { %3537 = shalt.err (!%p3534_p9)
}
  0x33   :  { %s3595_s1 = smov 128   ;;  %s3596_s30 = smov 8  }
  0x34   :  { %56 = dma.hbm_to_vmem [thread:$0]  %s4134_s4, 2048, %s51_s10, [#allocation6], %s3595_s1, %s3595_s1, %s3596_s30  }
  0x35   :  { %s3597_s21 = smov [#allocation8]   ;;  %s3538_s25 = scalar_lea.hbm %s4135_s5, 2048 }
  0x36   :  { %s62_s22 = sshll.u32 %s3597_s21, 4  ;;  %p3539_p10 = scmp.ne.s32.totalorder %s4135_s5, %s3538_s25  ;;  %s63_s22 = int_to_ptr.vmem [resolvable:$true] %s62_s22 }
  0x37   :  { %p3542_p11 = scmp.lt.u32.totalorder %s3538_s25, %s4135_s5 }
  0x39   :  { %p3544_p12 = pnand %p3542_p11, %p3539_p10 }
  0x3b   :  { %3547 = shalt.err (!%p3544_p12)
}
  0x3c   :  { %s3548_s28 = scalar_lea.vmem %s63_s22, 2048  ;;  %p3553_p0 = scmp.lt.s32.totalorder %s63_s22, %s63_s22 }
  0x3d   :  { %p3549_p13 = scmp.ne.s32.totalorder %s63_s22, %s3548_s28  ;;  %p3554_p1 = scmp.lt.s32.totalorder %s3548_s28, %s3548_s28 }
  0x3f   :  { %p3555_p2 = por %p3554_p1, %p3553_p0 }
  0x41   :  { %p3556_p3 = pnand %p3555_p2, %p3549_p13 }
  0x43   :  { %3559 = shalt.err (!%p3556_p3)
}
  0x44   :  { %68 = dma.hbm_to_vmem [thread:$0]  %s4135_s5, 2048, %s63_s22, [#allocation9], %s3595_s1, %s3595_s1, %s3596_s30  }
  0x45   :  { %3582 = dma.done.wait [#allocation3], 3072  }
  0x46   :  { %3583 = vsyncadd [#allocation3], 4294964224 }
  0x47   :  { %3584 = dma.done.wait [#allocation6], 5120  }
  0x48   :  { %3585 = vsyncadd [#allocation6], 4294962176 }
  0x49   :  { %3586 = dma.done.wait [#allocation9], 2048  }
  0x4a   :  { %3587 = vsyncadd [#allocation9], 4294965248  ;;  %v3404_v0 = vld [vmem:[#allocation2] sm:$0xff]   ;;  %v3405_v1 = vld [vmem:[#allocation2 + $0x8] sm:$0xff]   ;;  %v3598_v30 = vmov 0.0|0.0   ;;  %vm3599_vm0 = vmmov 0   ;;  %v86_v32 = vlaneseq }
  0x4b   :  { %2656 = vmatprep.subr.bf16.mxu0 %v3404_v0  ;;  %v3406_v2 = vld [vmem:[#allocation2 + $0x10] sm:$0xff]   ;;  %v3411_v3 = vld [vmem:[#allocation2 + $0x80] sm:$0xff]   ;;  %v3407_v4 = vld [vmem:[#allocation2 + $0x18] sm:$0xff]   ;;  %v3600_v31 = vmov 0.0   ;;  %vm591_vm7 = vcmask 261120   ;;  %vm735_vm8 = vcmask 64512  }
  0x4c   :  { %2657 = vmatpush3.bf16.msra.mxu0 %v3404_v0  ;;  %2676 = vmatprep.subr.bf16.mxu1 %v3411_v3  ;;  %v3413_v5 = vld [vmem:[#allocation2 + $0x88] sm:$0xff]   ;;  %v206_v6 = vld [vmem:[%s4130_s0] sm:$0xff]  ;;  %v3415_v10 = vld [vmem:[#allocation2 + $0x90] sm:$0xff]   ;;  %v3723_v34 = vshrl.u32 %v86_v32, 7  ;;  %s3601_s20 = smov [#allocation10]  }
  0x4d   :  { %2658 = vmatprep.subr.bf16.mxu0 %v3405_v1  ;;  %2677 = vmatpush3.bf16.msra.mxu1 %v3411_v3  ;;  %v207_v7 = vld [vmem:[%s4130_s0 + $0x8] sm:$0xff]  ;;  %v3408_v9 = vld [vmem:[#allocation2 + $0x20] sm:$0xff]   ;;  %v3417_v11 = vld [vmem:[#allocation2 + $0x98] sm:$0xff]   ;;  %s2316_s17 = sshll.u32 %s3601_s20, 4  ;;  %s2317_s17 = int_to_ptr.vmem [resolvable:$true] %s2316_s17 }
  0x4e   :  { %2678 = vmatprep.subr.bf16.mxu1 %v3413_v5  ;;  %v210_v8 = vpack.c.bf16 %v207_v7, %v206_v6  ;;  %v3409_v12 = vld [vmem:[#allocation2 + $0x28] sm:$0xff]   ;;  %v3419_v13 = vld [vmem:[#allocation2 + $0xa0] sm:$0xff]   ;;  %v3410_v14 = vld [vmem:[#allocation2 + $0x30] sm:$0xff]   ;;  %vm460_vm1 = vcmp.lt.s32.totalorder %v3723_v34, 1  ;;  %vm570_vm2 = vcmp.lt.s32.totalorder %v3723_v34, 7  ;;  %v89_v58 = vadd.s32 16, %v3723_v34  ;;  %p3565_p5 = scmp.lt.s32.totalorder %s2317_s17, %s2317_s17 }
  0x4f   :  { %v3421_v15 = vld [vmem:[#allocation2 + $0xa8] sm:$0xff]   ;;  %v3412_v16 = vld [vmem:[#allocation2 + $0x38] sm:$0xff]   ;;  %v208_v17 = vld [vmem:[%s4130_s0 + $0x10] sm:$0xff]  ;;  %v90_v60 = vadd.s32 24, %v3723_v34  ;;  %v95_v61 = vand.u32 15, %v3723_v34  ;;  %v88_v62 = vadd.s32 8, %v3723_v34 }
  0x50   :  { %2659 = vmatpush3.bf16.msra.mxu0 %v3405_v1  ;;  %2672 = vmatprep.mubr.bf16.mxu0 %v210_v8  ;;  %v209_v18 = vld [vmem:[%s4130_s0 + $0x18] sm:$0xff]  ;;  %v3423_v19 = vld [vmem:[#allocation2 + $0xb0] sm:$0xff]   ;;  %v3414_v20 = vld [vmem:[#allocation2 + $0x40] sm:$0xff]   ;;  %v109_v59 = vand.u32 15, %v89_v58  ;;  %s3560_s21 = scalar_lea.vmem %s2317_s17, 512 }
  0x51   :  { %2660 = vmatprep.subr.bf16.mxu0 %v3406_v2  ;;  %2692 = vmatprep.mubr.bf16.mxu1 %v210_v8  ;;  %v3425_v21 = vld [vmem:[#allocation2 + $0xb8] sm:$0xff]   ;;  %v211_v22 = vpack.c.bf16 %v209_v18, %v208_v17  ;;  %v3416_v23 = vld [vmem:[#allocation2 + $0x48] sm:$0xff]   ;;  %v3418_v24 = vld [vmem:[#allocation2 + $0x50] sm:$0xff]   ;;  %v116_v63 = vand.u32 15, %v90_v60  ;;  %vm139_vm4 = vcmp.gt.s32.totalorder %v95_v61, 0  ;;  %v102_v0 = vand.u32 15, %v88_v62  ;;  %p3561_p4 = scmp.ne.s32.totalorder %s2317_s17, %s3560_s21  ;;  %p3566_p6 = scmp.lt.s32.totalorder %s3560_s21, %s3560_s21 }
  0x52   :  { %2679 = vmatpush3.bf16.msra.mxu1 %v3413_v5  ;;  %v3420_v25 = vld [vmem:[#allocation2 + $0x58] sm:$0xff]   ;;  %v3422_v26 = vld [vmem:[#allocation2 + $0x60] sm:$0xff]   ;;  %v3424_v27 = vld [vmem:[#allocation2 + $0x68] sm:$0xff]   ;;  %vm141_vm3 = vcmp.gt.s32.totalorder %v109_v59, 0 }
  0x53   :  { %2680 = vmatprep.subr.bf16.mxu1 %v3415_v10  ;;  %v3426_v28 = vld [vmem:[#allocation2 + $0x70] sm:$0xff]   ;;  %v3427_v29 = vld [vmem:[#allocation2 + $0x78] sm:$0xff]   ;;  %v3748_v1 = vsel %vm141_vm3, 1.0, %v3600_v31  ;;  %vm154_vm5 = vcmp.lt.s32.totalorder %v116_v63, 15  ;;  %vm152_vm6 = vcmp.lt.s32.totalorder %v102_v0, 15  ;;  %v3782_v32 = vld [vmem:[%s4136_s6] sm:$0xff]  ;;  %p3567_p7 = por %p3566_p6, %p3565_p5 }
  0x54   :  { %2661 = vmatpush3.bf16.msra.mxu0 %v3406_v2  ;;  %v3751_v2 = vsel %vm139_vm4, 1.0, %v3600_v31  ;;  %v3756_v6 = vsel %vm154_vm5, 1.0, %v3600_v31  ;;  %v3823_v58 = vld [vmem:[%s4137_s7] sm:$0xff]  ;;  %v185_v60 = vld [vmem:[#allocation8 + $0x8] sm:$0xff]  ;;  %v186_v61 = vld [vmem:[#allocation8 + $0x10] sm:$0xff] }
  0x55   :  { %2662 = vmatprep.subr.bf16.mxu0 %v3407_v4  ;;  %v184_v59 = vld [vmem:[#allocation8] sm:$0xff]  ;;  %v187_v63 = vld [vmem:[#allocation8 + $0x18] sm:$0xff]  ;;  %p3568_p8 = pnand %p3567_p7, %p3561_p4 }
  0x56   :  { %2681 = vmatpush3.bf16.msra.mxu1 %v3415_v10  ;;  %v3827_v62 = vpack.c.bf16 %v185_v60, %v184_v59  ;;  %v3829_v0 = vpack.c.bf16 %v187_v63, %v186_v61  ;;  %v2395_v34 = vld [vmem:[%s4133_s3 + $0x3] ss:$0 sm:$0xff] }
  0x57   :  { %2682 = vmatprep.subr.bf16.mxu1 %v3417_v11 }
  0x58   :  { %2663 = vmatpush3.bf16.msra.mxu0 %v3407_v4 }
  0x59   :  { %2664 = vmatprep.subr.bf16.mxu0 %v3408_v9 }
  0x5a   :  { %2683 = vmatpush3.bf16.msra.mxu1 %v3417_v11 }
  0x5b   :  { %2684 = vmatprep.subr.bf16.mxu1 %v3419_v13 }
  0x5c   :  { %2665 = vmatpush3.bf16.msra.mxu0 %v3408_v9  ;;  %v3759_v9 = vsel %vm152_vm6, 1.0, %v3600_v31 }
  0x5d   :  { %2666 = vmatprep.subr.bf16.mxu0 %v3409_v12 }
  0x5e   :  { %2685 = vmatpush3.bf16.msra.mxu1 %v3419_v13 }
  0x5f   :  { %2686 = vmatprep.subr.bf16.mxu1 %v3421_v15 }
  0x60   :  { %2667 = vmatpush3.bf16.msra.mxu0 %v3409_v12 }
  0x61   :  { %2668 = vmatprep.subr.bf16.mxu0 %v3410_v14 }
  0x62   :  { %2687 = vmatpush3.bf16.msra.mxu1 %v3421_v15 }
  0x63   :  { %2688 = vmatprep.subr.bf16.mxu1 %v3423_v19 }
  0x64   :  { %2669 = vmatpush3.bf16.msra.mxu0 %v3410_v14 }
  0x65   :  { %2670 = vmatprep.subr.bf16.mxu0 %v3412_v16 }
  0x66   :  { %2689 = vmatpush3.bf16.msra.mxu1 %v3423_v19  ;;  %v2358_v19 = vld [vmem:[%s4133_s3] ss:$0 sm:$0xff] }
  0x67   :  { %2690 = vmatprep.subr.bf16.mxu1 %v3425_v21 }
  0x68   :  { %2671 = vmatpush3.bf16.msra.mxu0 %v3412_v16 }
  0x69   :  { %2696 = vmatprep.subr.bf16.mxu0 %v3414_v20 }
  0x6a   :  { %2691 = vmatpush3.bf16.msra.mxu1 %v3425_v21 }
  0x6b   :  { %2673 = vmatmul.mubr.bf16.vlgmr.msra.gmra.mrb[0].mxu0 %v211_v22  ;;  %3144 = vmatprep.subr.bf16.mxu1 %v3598_v30 }
  0x6c   :  { %2697 = vmatpush3.bf16.msra.mxu0 %v3414_v20  ;;  %2712 = vmatprep.mubr.bf16.mxu0 %v210_v8 }
  0x6d   :  { %2698 = vmatprep.subr.bf16.mxu0 %v3416_v23  ;;  %2693 = vmatmul.mubr.bf16.vlgmr.msra.gmra.mrb[0].mxu1 %v211_v22 }
  0x6e   :  { %2724 = vmatprep.mubr.msk.f32.mxu1 %vm3599_vm0, %v3600_v31 }
  0x70   :  { %2699 = vmatpush3.bf16.msra.mxu0 %v3416_v23 }
  0x71   :  { %2700 = vmatprep.subr.bf16.mxu0 %v3418_v24 }
  0x74   :  { %2701 = vmatpush3.bf16.msra.mxu0 %v3418_v24 }
  0x75   :  { %2702 = vmatprep.subr.bf16.mxu0 %v3420_v25 }
  0x78   :  { %2703 = vmatpush3.bf16.msra.mxu0 %v3420_v25 }
  0x79   :  { %2704 = vmatprep.subr.bf16.mxu0 %v3422_v26 }
  0x7c   :  { %2705 = vmatpush3.bf16.msra.mxu0 %v3422_v26 }
  0x7d   :  { %2706 = vmatprep.subr.bf16.mxu0 %v3424_v27 }
  0x80   :  { %2707 = vmatpush3.bf16.msra.mxu0 %v3424_v27  ;;  %v168_v27 = vld [vmem:[#allocation7] sm:$0xff] }
  0x81   :  { %2708 = vmatprep.subr.bf16.mxu0 %v3426_v28 }
  0x84   :  { %2709 = vmatpush3.bf16.msra.mxu0 %v3426_v28  ;;  %v169_v28 = vld [vmem:[#allocation7 + $0x8] sm:$0xff] }
  0x85   :  { %2710 = vmatprep.subr.bf16.mxu0 %v3427_v29 }
  0x88   :  { %2711 = vmatpush3.bf16.msra.mxu0 %v3427_v29 }
  0x89   :  { %3175 = vmatprep.subr.bf16.mxu0 %v3827_v62 }
  0x8b   :  { %2713 = vmatmul.mubr.bf16.vlgmr.msra.gmra.mrb[4].mxu0 %v211_v22 }
  0x8c   :  { %3177 = vmatpush3.bf16.msra.mxu0 %v3827_v62 }
  0x8d   :  { %3179 = vmatprep.subr.bf16.mxu0 %v3829_v0 }
  0x90   :  { %3181 = vmatpush3.bf16.msra.mxu0 %v3829_v0 }
 0x13e   :  { %v2674_v33 = vpop.f32.mrb[0].mxu0 }
 0x13f   :  { %v458_v35 = vrot.slane %v2674_v33, 7  ;;  %v310_v36 = vpop.f32.mrb[1].mxu0  ;;  %v3784_v33 = vpack.c.bf16 %v169_v28, %v168_v27  ;;  %v3862_v28 = vld [vmem:[%s4137_s7 + $0x8] sm:$0xff] }
 0x140   :  { %v456_v37 = vrot.slane %v310_v36, 7  ;;  %v2675_v38 = vpop.f32.mrb[2].mxu0  ;;  %v2694_v46 = vpop.f32.mrb[0].mxu1  ;;  %v171_v36 = vld [vmem:[#allocation7 + $0x18] sm:$0xff] }
 0x141   :  { %v459_v39 = vrot.slane %v2675_v38, 7  ;;  %v313_v40 = vpop.f32.mrb[3].mxu0  ;;  %v568_v47 = vrot.slane %v2694_v46, 1  ;;  %v441_v48 = vpop.f32.mrb[1].mxu1  ;;  %v172_v38 = vld [vmem:[#allocation7 + $0x20] sm:$0xff] }
 0x142   :  { %v457_v41 = vrot.slane %v313_v40, 7  ;;  %v566_v49 = vrot.slane %v441_v48, 1  ;;  %v2695_v50 = vpop.f32.mrb[2].mxu1  ;;  %v179_v48 = vld [vmem:[#allocation7 + $0x58] sm:$0xff] }
 0x143   :  { %v464_v42 = vsel %vm460_vm1, %v459_v39, %v456_v37  ;;  %v461_v43 = vsel %vm460_vm1, %v458_v35, %v459_v39  ;;  %v569_v51 = vrot.slane %v2695_v50, 1  ;;  %v444_v52 = vpop.f32.mrb[3].mxu1  ;;  %v173_v39 = vld [vmem:[#allocation7 + $0x28] sm:$0xff]  ;;  %v180_v50 = vld [vmem:[#allocation7 + $0x60] sm:$0xff] }
 0x144   :  { %v462_v44 = vsel %vm460_vm1, %v457_v41, %v458_v35  ;;  %v463_v45 = vsel %vm460_vm1, %v456_v37, %v457_v41  ;;  %v567_v53 = vrot.slane %v444_v52, 1  ;;  %v465_v5 = vmul.f32 %v3751_v2, %v464_v42  ;;  %v170_v35 = vld [vmem:[#allocation7 + $0x10] sm:$0xff]  ;;  %v175_v42 = vld [vmem:[#allocation7 + $0x38] sm:$0xff] }
 0x145   :  { %v574_v54 = vsel %vm570_vm2, %v569_v51, %v566_v49  ;;  %v571_v55 = vsel %vm570_vm2, %v568_v47, %v569_v51  ;;  %v467_v3 = vmul.f32 %v3748_v1, %v462_v44  ;;  %v3790_v37 = vpack.c.bf16 %v171_v36, %v170_v35  ;;  %v174_v41 = vld [vmem:[#allocation7 + $0x30] sm:$0xff]  ;;  %v176_v44 = vld [vmem:[#allocation7 + $0x40] sm:$0xff]  ;;  %v181_v51 = vld [vmem:[#allocation7 + $0x68] sm:$0xff] }
 0x146   :  { %v572_v56 = vsel %vm570_vm2, %v567_v53, %v568_v47  ;;  %v573_v57 = vsel %vm570_vm2, %v566_v49, %v567_v53  ;;  %v578_v14 = vmul.f32 %v3756_v6, %v574_v54  ;;  %v3796_v40 = vpack.c.bf16 %v173_v39, %v172_v38  ;;  %v178_v47 = vld [vmem:[#allocation7 + $0x50] sm:$0xff]  ;;  %v183_v54 = vld [vmem:[#allocation7 + $0x78] sm:$0xff] }
 0x147   :  { %v576_v18 = vmul.f32 %v3759_v9, %v572_v56  ;;  %v3808_v49 = vpack.c.bf16 %v179_v48, %v178_v47  ;;  %v3812_v52 = vpack.c.bf16 %v181_v51, %v180_v50  ;;  %v182_v53 = vld [vmem:[#allocation7 + $0x70] sm:$0xff]  ;;  %v3877_v36 = vld [vmem:[%s4137_s7 + $0x18] sm:$0xff] }
 0x148   :  { %v3867_v35 = vld [vmem:[%s4137_s7 + $0x10] sm:$0xff] }
 0x15e   :  { %v2714_v4 = vpop.f32.mrb[4].mxu0 }
 0x15f   :  { %v560_v7 = vadd.f32 %v2714_v4, %v467_v3  ;;  %v551_v8 = vpop.f32.mrb[5].mxu0  ;;  %v188_v3 = vld [vmem:[#allocation8 + $0x20] sm:$0xff]  ;;  %v189_v4 = vld [vmem:[#allocation8 + $0x28] sm:$0xff] }
 0x160   :  { %v552_v10 = vadd.f32 %v551_v8, %v465_v5  ;;  %v2715_v11 = vpop.f32.mrb[6].mxu0  ;;  %v3834_v5 = vpack.c.bf16 %v189_v4, %v188_v3  ;;  %v191_v8 = vld [vmem:[#allocation8 + $0x38] sm:$0xff]  ;;  %v3428_v3 = vld [vmem:[#allocation5] sm:$0xff]  }
 0x161   :  { %v581_v12 = vadd.f32 %v571_v55, %v560_v7  ;;  %v563_v13 = vadd.f32 %v2715_v11, %v461_v43  ;;  %v554_v15 = vpop.f32.mrb[7].mxu0  ;;  %v3800_v43 = vpack.c.bf16 %v175_v42, %v174_v41  ;;  %v3816_v55 = vpack.c.bf16 %v183_v54, %v182_v53  ;;  %v190_v7 = vld [vmem:[#allocation8 + $0x30] sm:$0xff]  ;;  %v192_v11 = vld [vmem:[#allocation8 + $0x40] sm:$0xff] }
 0x162   :  { %v579_v16 = vadd.f32 %v573_v57, %v552_v10  ;;  %v555_v17 = vadd.f32 %v554_v15, %v463_v45  ;;  %v177_v45 = vld [vmem:[#allocation7 + $0x48] sm:$0xff]  ;;  %3183 = vmatprep.subr.bf16.mxu0 %v3834_v5  ;;  %v3838_v10 = vpack.c.bf16 %v191_v8, %v190_v7  ;;  %v195_v15 = vld [vmem:[#allocation8 + $0x58] sm:$0xff]  ;;  %v3429_v4 = vld [vmem:[#allocation5 + $0x80] sm:$0xff]  }
 0x163   :  { %v582_v20 = vadd.f32 %v578_v14, %v563_v13  ;;  %v3774_v26 = vadd.f32 %v2358_v19, %v581_v12  ;;  %v3804_v46 = vpack.c.bf16 %v177_v45, %v176_v44  ;;  %v193_v12 = vld [vmem:[#allocation8 + $0x48] sm:$0xff]  ;;  %3185 = vmatpush3.bf16.msra.mxu0 %v3834_v5  ;;  %v194_v14 = vld [vmem:[#allocation8 + $0x50] sm:$0xff] }
 0x164   :  { %v580_v21 = vadd.f32 %v576_v18, %v555_v17  ;;  %v3766_v22 = vadd.f32 %v2358_v19, %v579_v16  ;;  %3187 = vmatprep.subr.bf16.mxu0 %v3838_v10  ;;  %v3842_v13 = vpack.c.bf16 %v193_v12, %v192_v11  ;;  %v3846_v16 = vpack.c.bf16 %v195_v15, %v194_v14  ;;  %v196_v17 = vld [vmem:[#allocation8 + $0x60] sm:$0xff]  ;;  %v197_v18 = vld [vmem:[#allocation8 + $0x68] sm:$0xff] }
 0x165   :  { %v3770_v24 = vadd.f32 %v2358_v19, %v582_v20  ;;  %v198_v20 = vld [vmem:[#allocation8 + $0x70] sm:$0xff]  ;;  %v3430_v14 = vld [vmem:[#allocation5 + $0x8] sm:$0xff]  }
 0x166   :  { %v3768_v23 = vadd.f32 %v2358_v19, %v580_v21  ;;  %v3850_v19 = vpack.c.bf16 %v197_v18, %v196_v17  ;;  %v199_v21 = vld [vmem:[#allocation8 + $0x78] sm:$0xff]  ;;  %v3431_v15 = vld [vmem:[#allocation5 + $0x88] sm:$0xff]   ;;  %v3432_v17 = vld [vmem:[#allocation5 + $0x10] sm:$0xff]  }
 0x167   :  { %v3148_v29 = vpack.c.bf16 %v3770_v24, %v3774_v26  ;;  %3189 = vmatpush3.bf16.msra.mxu0 %v3838_v10  ;;  %v3433_v18 = vld [vmem:[#allocation5 + $0x90] sm:$0xff]  }
 0x168   :  { %v3145_v25 = vpack.c.bf16 %v3768_v23, %v3766_v22  ;;  %3191 = vmatprep.subr.bf16.mxu0 %v3842_v13 }
 0x16a   :  { %3146 = vmatpush3.bf16.msra.mxu1 %v3145_v25  ;;  %v3854_v25 = vpack.c.bf16 %v199_v21, %v198_v20  ;;  %v3434_v20 = vld [vmem:[#allocation5 + $0x18] sm:$0xff]  }
 0x16b   :  { %3147 = vmatprep.subr.bf16.mxu1 %v3598_v30  ;;  %3193 = vmatpush3.bf16.msra.mxu0 %v3842_v13  ;;  %v3435_v21 = vld [vmem:[#allocation5 + $0x98] sm:$0xff]  }
 0x16c   :  { %3195 = vmatprep.subr.bf16.mxu0 %v3846_v16 }
 0x16e   :  { %3149 = vmatpush3.bf16.msra.mxu1 %v3148_v29 }
 0x16f   :  { %3150 = vmatprep.subr.bf16.mxu1 %v3598_v30  ;;  %3197 = vmatpush3.bf16.msra.mxu0 %v3846_v16 }
 0x170   :  { %3199 = vmatprep.subr.bf16.mxu0 %v3850_v19 }
 0x171   :  { %2725 = vmatmul.mubr.msk.f32.vlgmr.msra.gmra.mrb[4].mxu1 %vm591_vm7, %v3782_v32 }
 0x172   :  { %3152 = vmatpush3.bf16.msra.mxu1 %v3784_v33  ;;  %2759 = vmatprep.mubr.msk.f32.mxu1 %vm3599_vm0, %v3600_v31 }
 0x173   :  { %3153 = vmatprep.subr.bf16.mxu1 %v3598_v30  ;;  %3201 = vmatpush3.bf16.msra.mxu0 %v3850_v19 }
 0x174   :  { %3203 = vmatprep.subr.bf16.mxu0 %v3854_v25 }
 0x176   :  { %3155 = vmatpush3.bf16.msra.mxu1 %v3790_v37 }
 0x177   :  { %3156 = vmatprep.subr.bf16.mxu1 %v3598_v30  ;;  %3205 = vmatpush3.bf16.msra.mxu0 %v3854_v25 }
 0x17a   :  { %3158 = vmatpush3.bf16.msra.mxu1 %v3796_v40 }
 0x17b   :  { %3159 = vmatprep.subr.bf16.mxu1 %v3598_v30 }
 0x17e   :  { %3161 = vmatpush3.bf16.msra.mxu1 %v3800_v43 }
 0x17f   :  { %3162 = vmatprep.subr.bf16.mxu1 %v3598_v30 }
 0x182   :  { %3164 = vmatpush3.bf16.msra.mxu1 %v3804_v46 }
 0x183   :  { %3165 = vmatprep.subr.bf16.mxu1 %v3598_v30 }
 0x186   :  { %3167 = vmatpush3.bf16.msra.mxu1 %v3808_v49 }
 0x187   :  { %3168 = vmatprep.subr.bf16.mxu1 %v3598_v30 }
 0x18a   :  { %3170 = vmatpush3.bf16.msra.mxu1 %v3812_v52 }
 0x18b   :  { %3171 = vmatprep.subr.bf16.mxu1 %v3598_v30 }
 0x18e   :  { %3173 = vmatpush3.bf16.msra.mxu1 %v3816_v55 }
 0x244   :  { %v661_v56 = vpop.f32.mrb[4].mxu1 }
 0x245   :  { %v2726_v57 = vpop.f32.mrb[5].mxu1  ;;  %2760 = vmatmul.mubr.f32.vlgmr.msra.gmra.mrb[6].mxu1 %v661_v56 }
 0x246   :  { %2764 = vmatprep.mubr.msk.f32.mxu1 %vm735_vm8, %v3823_v58 }
 0x318   :  { %v731_v27 = vpop.f32.mrb[6].mxu1 }
 0x319   :  { %v2761_v29 = vpop.f32.mrb[7].mxu1  ;;  %2762 = vmatprep.subr.mxu1 %v731_v27 }
 0x31a   :  { %2763 = vmatpush3.msra.mxu1 %v731_v27  ;;  %v3436_v27 = vld [vmem:[#allocation5 + $0x20] sm:$0xff]  }
 0x31b   :  { %2765 = vmatmul.mubr.msk.f32.vlgmr.msra.gmra.mrb[8].mxu1 %vm735_vm8, %v3862_v28  ;;  %3206 = vmatprep.subr.bf16.mxu1 %v3598_v30  ;;  %v3437_v29 = vld [vmem:[#allocation5 + $0xa0] sm:$0xff]  }
 0x31c   :  { %2767 = vmatprep.mubr.msk.f32.mxu1 %vm735_vm8, %v3867_v35 }
 0x31f   :  { %2768 = vmatmul.mubr.msk.f32.gmra.mrb[10].mxu1 %vm735_vm8, %v3877_v36 }
 0x320   :  { %2816 = vmatprep.mubr.msk.f32.mxu1 %vm3599_vm0, %v3600_v31 }
 0x3ee   :  { %v2766_v38 = vpop.f32.mrb[8].mxu1 }
 0x3ef   :  { %v814_v39 = vpop.f32.mrb[9].mxu1 }
 0x3f0   :  { %2802 = vmatprep.mubr.f32.mxu0 %v814_v39  ;;  %v3439_v39 = vld [vmem:[#allocation5 + $0xa8] sm:$0xff]  }
 0x3f1   :  { %2803 = vmatmul.mubr.f32.vlgmr.msra.gmra.mrb[8].mxu0 %v2766_v38  ;;  %v3438_v38 = vld [vmem:[#allocation5 + $0x28] sm:$0xff]  }
 0x3f2   :  { %v2769_v41 = vpop.f32.mrb[10].mxu1 }
 0x3f3   :  { %v824_v42 = vpop.f32.mrb[11].mxu1 }
 0x3f4   :  { %2805 = vmatprep.mubr.f32.mxu0 %v824_v42  ;;  %v3441_v42 = vld [vmem:[#allocation5 + $0xb0] sm:$0xff]  }
 0x3f5   :  { %2806 = vmatmul.mubr.f32.gmra.mrb[10].mxu0 %v2769_v41  ;;  %v3440_v41 = vld [vmem:[#allocation5 + $0x30] sm:$0xff]  }
 0x3f6   :  { %2856 = vmatprep.mubr.msk.f32.mxu0 %vm735_vm8, %v3823_v58 }
 0x4c4   :  { %v2804_v44 = vpop.f32.mrb[8].mxu0 }
 0x4c5   :  { %v3886_v45 = vsub.f32 %v3768_v23, %v2804_v44  ;;  %v899_v47 = vpop.f32.mrb[9].mxu0  ;;  %v3442_v44 = vld [vmem:[#allocation5 + $0x38] sm:$0xff]  }
 0x4c6   :  { %v3889_v48 = vsub.f32 %v3766_v22, %v899_v47  ;;  %v3443_v47 = vld [vmem:[#allocation5 + $0xb8] sm:$0xff]  }
 0x4c7   :  { %v923_v50 = vmul.f32 %v3886_v45, %v3886_v45 }
 0x4c8   :  { %v922_v51 = vmul.f32 %v3889_v48, %v3889_v48  ;;  %v2807_v53 = vpop.f32.mrb[10].mxu0 }
 0x4c9   :  { %v3896_v54 = vsub.f32 %v3770_v24, %v2807_v53  ;;  %v909_v56 = vpop.f32.mrb[11].mxu0 }
 0x4ca   :  { %v3207_v57 = vpack.c.bf16 %v923_v50, %v922_v51  ;;  %v3899_v59 = vsub.f32 %v3774_v26, %v909_v56  ;;  %v3444_v50 = vld [vmem:[#allocation5 + $0x40] sm:$0xff]  }
 0x4cb   :  { %v925_v23 = vmul.f32 %v3896_v54, %v3896_v54 }
 0x4cc   :  { %v924_v22 = vmul.f32 %v3899_v59, %v3899_v59  ;;  %3208 = vmatpush3.bf16.msra.mxu1 %v3207_v57 }
 0x4cd   :  { %3209 = vmatprep.subr.bf16.mxu1 %v3598_v30 }
 0x4ce   :  { %v3210_v60 = vpack.c.bf16 %v925_v23, %v924_v22 }
 0x4d0   :  { %3211 = vmatpush3.bf16.msra.mxu1 %v3210_v60 }
 0x4d1   :  { %3212 = vmatprep.subr.bf16.mxu1 %v3598_v30 }
 0x4d3   :  { %2817 = vmatmul.mubr.msk.f32.vlgmr.msra.gmra.mrb[12].mxu1 %vm591_vm7, %v3782_v32 }
 0x4d4   :  { %3214 = vmatpush3.bf16.msra.mxu1 %v3784_v33  ;;  %2851 = vmatprep.mubr.msk.f32.mxu1 %vm3599_vm0, %v3600_v31 }
 0x4d5   :  { %3215 = vmatprep.subr.bf16.mxu1 %v3598_v30 }
 0x4d8   :  { %3217 = vmatpush3.bf16.msra.mxu1 %v3790_v37 }
 0x4d9   :  { %3218 = vmatprep.subr.bf16.mxu1 %v3598_v30 }
 0x4dc   :  { %3220 = vmatpush3.bf16.msra.mxu1 %v3796_v40 }
 0x4dd   :  { %3221 = vmatprep.subr.bf16.mxu1 %v3598_v30 }
 0x4e0   :  { %3223 = vmatpush3.bf16.msra.mxu1 %v3800_v43 }
 0x4e1   :  { %3224 = vmatprep.subr.bf16.mxu1 %v3598_v30 }
 0x4e4   :  { %3226 = vmatpush3.bf16.msra.mxu1 %v3804_v46 }
 0x4e5   :  { %3227 = vmatprep.subr.bf16.mxu1 %v3598_v30 }
 0x4e8   :  { %3229 = vmatpush3.bf16.msra.mxu1 %v3808_v49 }
 0x4e9   :  { %3230 = vmatprep.subr.bf16.mxu1 %v3598_v30 }
 0x4ec   :  { %3232 = vmatpush3.bf16.msra.mxu1 %v3812_v52 }
 0x4ed   :  { %3233 = vmatprep.subr.bf16.mxu1 %v3598_v30 }
 0x4f0   :  { %3235 = vmatpush3.bf16.msra.mxu1 %v3816_v55 }
 0x4f1   :  { %2900 = vmatprep.subr.bf16.mxu1 %v3428_v3 }
 0x5a6   :  { %v992_v24 = vpop.f32.mrb[12].mxu1 }
 0x5a7   :  { %v2818_v26 = vpop.f32.mrb[13].mxu1  ;;  %2852 = vmatmul.mubr.f32.vlgmr.msra.gmra.mrb[14].mxu1 %v992_v24 }
 0x5a8   :  { %2901 = vmatpush3.bf16.msra.mxu1 %v3428_v3 }
 0x5a9   :  { %2902 = vmatprep.subr.bf16.mxu1 %v3430_v14 }
 0x5ac   :  { %2903 = vmatpush3.bf16.msra.mxu1 %v3430_v14 }
 0x5ad   :  { %2904 = vmatprep.subr.bf16.mxu1 %v3432_v17 }
 0x5b0   :  { %2905 = vmatpush3.bf16.msra.mxu1 %v3432_v17 }
 0x5b1   :  { %2906 = vmatprep.subr.bf16.mxu1 %v3434_v20 }
 0x5b4   :  { %2907 = vmatpush3.bf16.msra.mxu1 %v3434_v20 }
 0x5b5   :  { %2908 = vmatprep.subr.bf16.mxu1 %v3436_v27 }
 0x5b8   :  { %2909 = vmatpush3.bf16.msra.mxu1 %v3436_v27 }
 0x5b9   :  { %2910 = vmatprep.subr.bf16.mxu1 %v3438_v38 }
 0x5bc   :  { %2911 = vmatpush3.bf16.msra.mxu1 %v3438_v38 }
 0x5bd   :  { %2912 = vmatprep.subr.bf16.mxu1 %v3440_v41 }
 0x5c0   :  { %2913 = vmatpush3.bf16.msra.mxu1 %v3440_v41 }
 0x5c1   :  { %2914 = vmatprep.subr.bf16.mxu1 %v3442_v44 }
 0x5c4   :  { %2915 = vmatpush3.bf16.msra.mxu1 %v3442_v44 }
 0x5c5   :  { %2940 = vmatprep.subr.bf16.mxu1 %v3444_v50 }
 0x67a   :  { %v1062_v61 = vpop.f32.mrb[14].mxu1 }
 0x67b   :  { %v2853_v63 = vpop.f32.mrb[15].mxu1  ;;  %2854 = vmatprep.subr.mxu0 %v1062_v61 }
 0x67c   :  { %2855 = vmatpush3.msra.mxu0 %v1062_v61  ;;  %v2369_v61 = vld [vmem:[%s4133_s3 + $0x1] ss:$0 sm:$0xff] }
 0x67d   :  { %2857 = vmatmul.mubr.msk.f32.vlgmr.msra.gmra.mrb[12].mxu0 %vm735_vm8, %v3862_v28  ;;  %3237 = vmatprep.subr.bf16.mxu0 %v3827_v62 }
 0x67e   :  { %2859 = vmatprep.mubr.msk.f32.mxu0 %vm735_vm8, %v3867_v35  ;;  %3239 = vmatpush3.bf16.msra.mxu0 %v3827_v62 }
 0x67f   :  { %3241 = vmatprep.subr.bf16.mxu0 %v3829_v0 }
 0x681   :  { %2860 = vmatmul.mubr.msk.f32.gmra.mrb[14].mxu0 %vm735_vm8, %v3877_v36 }
 0x682   :  { %3243 = vmatpush3.bf16.msra.mxu0 %v3829_v0 }
 0x683   :  { %3245 = vmatprep.subr.bf16.mxu0 %v3834_v5 }
 0x686   :  { %3247 = vmatpush3.bf16.msra.mxu0 %v3834_v5 }
 0x687   :  { %3249 = vmatprep.subr.bf16.mxu0 %v3838_v10 }
 0x68a   :  { %3251 = vmatpush3.bf16.msra.mxu0 %v3838_v10 }
 0x68b   :  { %3253 = vmatprep.subr.bf16.mxu0 %v3842_v13 }
 0x68e   :  { %3255 = vmatpush3.bf16.msra.mxu0 %v3842_v13 }
 0x68f   :  { %3257 = vmatprep.subr.bf16.mxu0 %v3846_v16 }
 0x692   :  { %3259 = vmatpush3.bf16.msra.mxu0 %v3846_v16 }
 0x693   :  { %3261 = vmatprep.subr.bf16.mxu0 %v3850_v19 }
 0x696   :  { %3263 = vmatpush3.bf16.msra.mxu0 %v3850_v19 }
 0x697   :  { %3265 = vmatprep.subr.bf16.mxu0 %v3854_v25 }
 0x69a   :  { %3267 = vmatpush3.bf16.msra.mxu0 %v3854_v25 }
 0x69b   :  { %2920 = vmatprep.subr.bf16.mxu0 %v3429_v4 }
 0x750   :  { %v2858_v7 = vpop.f32.mrb[12].mxu0 }
 0x751   :  { %v1132_v8 = vpop.f32.mrb[13].mxu0 }
 0x752   :  { %2894 = vmatprep.mubr.f32.mxu0 %v1132_v8 }
 0x753   :  { %2895 = vmatmul.mubr.f32.vlgmr.msra.gmra.mrb[16].mxu0 %v2858_v7 }
 0x754   :  { %v2861_v11 = vpop.f32.mrb[14].mxu0  ;;  %2921 = vmatpush3.bf16.msra.mxu0 %v3429_v4  ;;  %v2370_v4 = vld [vmem:[%s4133_s3 + $0x2] ss:$0 sm:$0xff] }
 0x755   :  { %v1142_v12 = vpop.f32.mrb[15].mxu0  ;;  %2922 = vmatprep.subr.bf16.mxu0 %v3431_v15 }
 0x756   :  { %2897 = vmatprep.mubr.f32.mxu0 %v1142_v12 }
 0x757   :  { %2898 = vmatmul.mubr.f32.gmra.mrb[18].mxu0 %v2861_v11 }
 0x758   :  { %2923 = vmatpush3.bf16.msra.mxu0 %v3431_v15 }
 0x759   :  { %2924 = vmatprep.subr.bf16.mxu0 %v3433_v18 }
 0x75c   :  { %2925 = vmatpush3.bf16.msra.mxu0 %v3433_v18 }
 0x75d   :  { %2926 = vmatprep.subr.bf16.mxu0 %v3435_v21 }
 0x760   :  { %2927 = vmatpush3.bf16.msra.mxu0 %v3435_v21 }
 0x761   :  { %2928 = vmatprep.subr.bf16.mxu0 %v3437_v29 }
 0x764   :  { %2929 = vmatpush3.bf16.msra.mxu0 %v3437_v29 }
 0x765   :  { %2930 = vmatprep.subr.bf16.mxu0 %v3439_v39 }
 0x768   :  { %2931 = vmatpush3.bf16.msra.mxu0 %v3439_v39 }
 0x769   :  { %2932 = vmatprep.subr.bf16.mxu0 %v3441_v42 }
 0x76c   :  { %2933 = vmatpush3.bf16.msra.mxu0 %v3441_v42 }
 0x76d   :  { %2934 = vmatprep.subr.bf16.mxu0 %v3443_v47 }
 0x770   :  { %2935 = vmatpush3.bf16.msra.mxu0 %v3443_v47  ;;  %v3445_v47 = vld [vmem:[#allocation5 + $0x48] sm:$0xff]  }
 0x771   :  { %3268 = vmatprep.subr.bf16.mxu0 %v3598_v30 }
 0x826   :  { %v2896_v51 = vpop.f32.mrb[16].mxu0 }
 0x827   :  { %v1223_v53 = vadd.f32 1e-05, %v2896_v51  ;;  %v1217_v56 = vpop.f32.mrb[17].mxu0  ;;  %v3448_v51 = vld [vmem:[#allocation5 + $0x60] sm:$0xff]  }
 0x828   :  { %v1218_v57 = vadd.f32 1e-05, %v1217_v56  ;;  %v3450_v56 = vld [vmem:[#allocation5 + $0x70] sm:$0xff]  }
 0x829   :  { %3452 = vrsqrt.f32 %v1223_v53  ;;  %v3449_v53 = vld [vmem:[#allocation5 + $0x68] sm:$0xff]  }
 0x82a   :  { %3454 = vrsqrt.f32 %v1218_v57  ;;  %v2899_v23 = vpop.f32.mrb[18].mxu0 }
 0x82b   :  { %v1233_v22 = vadd.f32 1e-05, %v2899_v23  ;;  %v1227_v60 = vpop.f32.mrb[19].mxu0 }
 0x82c   :  { %v1228_v24 = vadd.f32 1e-05, %v1227_v60 }
 0x82d   :  { %3456 = vrsqrt.f32 %v1233_v22 }
 0x82e   :  { %3458 = vrsqrt.f32 %v1228_v24 }
 0x833   :  { %v3453_v26 = vpop.eup %3452 }
 0x834   :  { %v3455_v63 = vpop.eup %3454  ;;  %v1241_v3 = vmul.f32 %v3453_v26, %v3886_v45 }
 0x835   :  { %v1240_v7 = vmul.f32 %v3455_v63, %v3889_v48 }
 0x836   :  { %v1249_v8 = vmul.f32 %v2369_v61, %v1241_v3 }
 0x837   :  { %v3457_v11 = vpop.eup %3456  ;;  %v1248_v12 = vmul.f32 %v2369_v61, %v1240_v7 }
 0x838   :  { %v3459_v14 = vpop.eup %3458  ;;  %v1243_v15 = vmul.f32 %v3457_v11, %v3896_v54  ;;  %v1257_v17 = vadd.f32 %v2370_v4, %v1249_v8  ;;  %v3446_v54 = vld [vmem:[#allocation5 + $0x50] sm:$0xff]  }
 0x839   :  { %v1242_v18 = vmul.f32 %v3459_v14, %v3899_v59  ;;  %v1256_v20 = vadd.f32 %v2370_v4, %v1248_v12  ;;  %v3447_v59 = vld [vmem:[#allocation5 + $0x58] sm:$0xff]  }
 0x83a   :  { %v1261_v21 = vmax.f32 %v1257_v17, 0.0  ;;  %v1251_v27 = vmul.f32 %v2369_v61, %v1243_v15 }
 0x83b   :  { %v1260_v29 = vmax.f32 %v1256_v20, 0.0  ;;  %v1250_v45 = vmul.f32 %v2369_v61, %v1242_v18 }
 0x83c   :  { %v1259_v38 = vadd.f32 %v2370_v4, %v1251_v27 }
 0x83d   :  { %v1264_v39 = vpack.c.bf16 %v1261_v21, %v1260_v29  ;;  %v1258_v41 = vadd.f32 %v2370_v4, %v1250_v45 }
 0x83e   :  { %v1263_v42 = vmax.f32 %v1259_v38, 0.0 }
 0x83f   :  { %2916 = vmatprep.mubr.bf16.mxu1 %v1264_v39  ;;  %2936 = vmatprep.mubr.bf16.mxu0 %v1264_v39  ;;  %v1262_v48 = vmax.f32 %v1258_v41, 0.0 }
 0x841   :  { %v1265_v44 = vpack.c.bf16 %v1263_v42, %v1262_v48 }
 0x843   :  { %2917 = vmatmul.mubr.bf16.vlgmr.msra.gmra.mrb[16].mxu1 %v1265_v44  ;;  %2937 = vmatmul.mubr.bf16.vlgmr.msra.gmra.mrb[20].mxu0 %v1265_v44 }
 0x844   :  { %2941 = vmatpush3.bf16.msra.mxu1 %v3444_v50  ;;  %2956 = vmatprep.mubr.bf16.mxu1 %v1264_v39  ;;  %v3451_v50 = vld [vmem:[#allocation5 + $0x78] sm:$0xff]  }
 0x845   :  { %2942 = vmatprep.subr.bf16.mxu1 %v3445_v47  ;;  %2968 = vmatprep.mubr.msk.f32.mxu0 %vm3599_vm0, %v3600_v31 }
 0x848   :  { %2943 = vmatpush3.bf16.msra.mxu1 %v3445_v47 }
 0x849   :  { %2944 = vmatprep.subr.bf16.mxu1 %v3446_v54 }
 0x84c   :  { %2945 = vmatpush3.bf16.msra.mxu1 %v3446_v54 }
 0x84d   :  { %2946 = vmatprep.subr.bf16.mxu1 %v3447_v59 }
 0x850   :  { %2947 = vmatpush3.bf16.msra.mxu1 %v3447_v59 }
 0x851   :  { %2948 = vmatprep.subr.bf16.mxu1 %v3448_v51 }
 0x854   :  { %2949 = vmatpush3.bf16.msra.mxu1 %v3448_v51 }
 0x855   :  { %2950 = vmatprep.subr.bf16.mxu1 %v3449_v53 }
 0x858   :  { %2951 = vmatpush3.bf16.msra.mxu1 %v3449_v53 }
 0x859   :  { %2952 = vmatprep.subr.bf16.mxu1 %v3450_v56 }
 0x85c   :  { %2953 = vmatpush3.bf16.msra.mxu1 %v3450_v56 }
 0x85d   :  { %2954 = vmatprep.subr.bf16.mxu1 %v3451_v50 }
 0x860   :  { %2955 = vmatpush3.bf16.msra.mxu1 %v3451_v50 }
 0x861   :  { %3274 = vmatprep.subr.bf16.mxu1 %v3598_v30 }
 0x863   :  { %2957 = vmatmul.mubr.bf16.vlgmr.msra.gmra.mrb[20].mxu1 %v1265_v44 }
 0x864   :  { %3276 = vmatpush3.bf16.msra.mxu1 %v3784_v33  ;;  %3003 = vmatprep.mubr.msk.f32.mxu1 %vm3599_vm0, %v3600_v31 }
 0x865   :  { %3277 = vmatprep.subr.bf16.mxu1 %v3598_v30 }
 0x868   :  { %3279 = vmatpush3.bf16.msra.mxu1 %v3790_v37 }
 0x869   :  { %3280 = vmatprep.subr.bf16.mxu1 %v3598_v30 }
 0x86c   :  { %3282 = vmatpush3.bf16.msra.mxu1 %v3796_v40 }
 0x86d   :  { %3283 = vmatprep.subr.bf16.mxu1 %v3598_v30 }
 0x870   :  { %3285 = vmatpush3.bf16.msra.mxu1 %v3800_v43 }
 0x871   :  { %3286 = vmatprep.subr.bf16.mxu1 %v3598_v30 }
 0x874   :  { %3288 = vmatpush3.bf16.msra.mxu1 %v3804_v46 }
 0x875   :  { %3289 = vmatprep.subr.bf16.mxu1 %v3598_v30 }
 0x878   :  { %3291 = vmatpush3.bf16.msra.mxu1 %v3808_v49 }
 0x879   :  { %3292 = vmatprep.subr.bf16.mxu1 %v3598_v30 }
 0x87c   :  { %3294 = vmatpush3.bf16.msra.mxu1 %v3812_v52 }
 0x87d   :  { %3295 = vmatprep.subr.bf16.mxu1 %v3598_v30 }
 0x880   :  { %3297 = vmatpush3.bf16.msra.mxu1 %v3816_v55 }
 0x881   :  { %3330 = vmatprep.subr.bf16.mxu1 %v3598_v30 }
 0x916   :  { %v2918_v57 = vpop.f32.mrb[16].mxu1  ;;  %v2938_v23 = vpop.f32.mrb[20].mxu0 }
 0x917   :  { %v1364_v22 = vpop.f32.mrb[17].mxu1  ;;  %v1495_v60 = vpop.f32.mrb[21].mxu0  ;;  %v1512_v3 = vrot.slane %v2918_v57, 7  ;;  %v1621_v4 = vrot.slane %v2938_v23, 1 }
 0x918   :  { %v1510_v24 = vrot.slane %v1364_v22, 7  ;;  %v1619_v26 = vrot.slane %v1495_v60, 1  ;;  %v2919_v61 = vpop.f32.mrb[18].mxu1  ;;  %v2939_v63 = vpop.f32.mrb[22].mxu0 }
 0x919   :  { %v1513_v7 = vrot.slane %v2919_v61, 7  ;;  %v1622_v8 = vrot.slane %v2939_v63, 1  ;;  %v1367_v11 = vpop.f32.mrb[19].mxu1  ;;  %v1498_v12 = vpop.f32.mrb[23].mxu0 }
 0x91a   :  { %v1511_v14 = vrot.slane %v1367_v11, 7  ;;  %v1620_v15 = vrot.slane %v1498_v12, 1 }
 0x91b   :  { %v1626_v17 = vsel %vm570_vm2, %v1622_v8, %v1619_v26  ;;  %v1623_v18 = vsel %vm570_vm2, %v1621_v4, %v1622_v8  ;;  %v1517_v20 = vsel %vm460_vm1, %v1513_v7, %v1510_v24  ;;  %v1514_v21 = vsel %vm460_vm1, %v1512_v3, %v1513_v7 }
 0x91c   :  { %v1624_v27 = vsel %vm570_vm2, %v1620_v15, %v1621_v4  ;;  %v1515_v29 = vsel %vm460_vm1, %v1511_v14, %v1512_v3  ;;  %v1625_v45 = vsel %vm570_vm2, %v1619_v26, %v1620_v15  ;;  %v1516_v38 = vsel %vm460_vm1, %v1510_v24, %v1511_v14 }
 0x91d   :  { %v1520_v39 = vmul.f32 %v3748_v1, %v1515_v29  ;;  %v1518_v42 = vmul.f32 %v3751_v2, %v1517_v20  ;;  %v1630_v53 = vmul.f32 %v3756_v6, %v1626_v17  ;;  %v1628_v23 = vmul.f32 %v3759_v9, %v1624_v27 }
 0x936   :  { %v2958_v41 = vpop.f32.mrb[20].mxu1 }
 0x937   :  { %v1613_v48 = vadd.f32 %v2958_v41, %v1520_v39  ;;  %v1604_v44 = vpop.f32.mrb[21].mxu1 }
 0x938   :  { %v1605_v47 = vadd.f32 %v1604_v44, %v1518_v42  ;;  %v2959_v54 = vpop.f32.mrb[22].mxu1 }
 0x939   :  { %v1633_v59 = vadd.f32 %v1623_v18, %v1613_v48  ;;  %v1616_v51 = vadd.f32 %v2959_v54, %v1514_v21  ;;  %v1607_v56 = vpop.f32.mrb[23].mxu1 }
 0x93a   :  { %v1631_v50 = vadd.f32 %v1625_v45, %v1605_v47  ;;  %v1608_v57 = vadd.f32 %v1607_v56, %v1516_v38 }
 0x93b   :  { %v1634_v1 = vadd.f32 %v1630_v53, %v1616_v51  ;;  %v1641_v61 = vadd.f32 %v2395_v34, %v1633_v59 }
 0x93c   :  { %v1632_v22 = vadd.f32 %v1628_v23, %v1608_v57  ;;  %v1639_v2 = vadd.f32 %v2395_v34, %v1631_v50 }
 0x93d   :  { %v1642_v24 = vadd.f32 %v2395_v34, %v1634_v1 }
 0x93e   :  { %v1640_v60 = vadd.f32 %v2395_v34, %v1632_v22  ;;  %v3468_v22 = vld [vmem:[%s4130_s0 + $0x8] sm:$0xff] }
 0x93f   :  { %v3272_v6 = vpack.c.bf16 %v1642_v24, %v1641_v61 }
 0x940   :  { %v3269_v26 = vpack.c.bf16 %v1640_v60, %v1639_v2 }
 0x942   :  { %3270 = vmatpush3.bf16.msra.mxu0 %v3269_v26 }
 0x943   :  { %3271 = vmatprep.subr.bf16.mxu0 %v3598_v30 }
 0x946   :  { %3273 = vmatpush3.bf16.msra.mxu0 %v3272_v6 }
 0x949   :  { %2969 = vmatmul.mubr.msk.f32.vlgmr.msra.gmra.mrb[24].mxu0 %vm591_vm7, %v3782_v32 }
 0x94a   :  { %3008 = vmatprep.mubr.msk.f32.mxu0 %vm735_vm8, %v3823_v58 }
 0xa1c   :  { %v1709_v9 = vpop.f32.mrb[24].mxu0 }
 0xa1d   :  { %v2970_v63 = vpop.f32.mrb[25].mxu0  ;;  %3004 = vmatmul.mubr.f32.vlgmr.msra.gmra.mrb[24].mxu1 %v1709_v9 }
 0xa1e   :  { %3060 = vmatprep.mubr.msk.f32.mxu1 %vm3599_vm0, %v3600_v31 }
 0xaf0   :  { %v1779_v3 = vpop.f32.mrb[24].mxu1 }
 0xaf1   :  { %v3005_v4 = vpop.f32.mrb[25].mxu1  ;;  %3006 = vmatprep.subr.mxu0 %v1779_v3 }
 0xaf2   :  { %3007 = vmatpush3.msra.mxu0 %v1779_v3  ;;  %v3470_v3 = vld [vmem:[%s4130_s0 + $0x18] sm:$0xff] }
 0xaf3   :  { %3009 = vmatmul.mubr.msk.f32.vlgmr.msra.gmra.mrb[26].mxu0 %vm735_vm8, %v3862_v28  ;;  %3299 = vmatprep.subr.bf16.mxu0 %v3827_v62 }
 0xaf4   :  { %3011 = vmatprep.mubr.msk.f32.mxu0 %vm735_vm8, %v3867_v35  ;;  %3301 = vmatpush3.bf16.msra.mxu0 %v3827_v62 }
 0xaf5   :  { %3303 = vmatprep.subr.bf16.mxu0 %v3829_v0 }
 0xaf7   :  { %3012 = vmatmul.mubr.msk.f32.gmra.mrb[28].mxu0 %vm735_vm8, %v3877_v36 }
 0xaf8   :  { %3305 = vmatpush3.bf16.msra.mxu0 %v3829_v0 }
 0xaf9   :  { %3307 = vmatprep.subr.bf16.mxu0 %v3834_v5 }
 0xafc   :  { %3309 = vmatpush3.bf16.msra.mxu0 %v3834_v5 }
 0xafd   :  { %3311 = vmatprep.subr.bf16.mxu0 %v3838_v10 }
 0xb00   :  { %3313 = vmatpush3.bf16.msra.mxu0 %v3838_v10 }
 0xb01   :  { %3315 = vmatprep.subr.bf16.mxu0 %v3842_v13 }
 0xb04   :  { %3317 = vmatpush3.bf16.msra.mxu0 %v3842_v13 }
 0xb05   :  { %3319 = vmatprep.subr.bf16.mxu0 %v3846_v16 }
 0xb08   :  { %3321 = vmatpush3.bf16.msra.mxu0 %v3846_v16 }
 0xb09   :  { %3323 = vmatprep.subr.bf16.mxu0 %v3850_v19 }
 0xb0c   :  { %3325 = vmatpush3.bf16.msra.mxu0 %v3850_v19 }
 0xb0d   :  { %3327 = vmatprep.subr.bf16.mxu0 %v3854_v25 }
 0xb10   :  { %3329 = vmatpush3.bf16.msra.mxu0 %v3854_v25 }
 0xbc6   :  { %v3010_v7 = vpop.f32.mrb[26].mxu0 }
 0xbc7   :  { %v1849_v8 = vpop.f32.mrb[27].mxu0 }
 0xbc8   :  { %3046 = vmatprep.mubr.f32.mxu0 %v1849_v8 }
 0xbc9   :  { %3047 = vmatmul.mubr.f32.vlgmr.msra.gmra.mrb[30].mxu0 %v3010_v7  ;;  %v3471_v7 = vld [vmem:[%s4130_s0 + $0x10] sm:$0xff] }
 0xbca   :  { %v3013_v11 = vpop.f32.mrb[28].mxu0 }
 0xbcb   :  { %v1859_v12 = vpop.f32.mrb[29].mxu0 }
 0xbcc   :  { %3049 = vmatprep.mubr.f32.mxu0 %v1859_v12 }
 0xbcd   :  { %3050 = vmatmul.mubr.f32.gmra.mrb[32].mxu0 %v3013_v11 }
 0xbce   :  { %3100 = vmatprep.mubr.msk.f32.mxu0 %vm735_vm8, %v3823_v58 }
 0xc9c   :  { %v3048_v14 = vpop.f32.mrb[30].mxu0 }
 0xc9d   :  { %v4034_v15 = vsub.f32 %v1640_v60, %v3048_v14  ;;  %v1934_v17 = vpop.f32.mrb[31].mxu0 }
 0xc9e   :  { %v4036_v18 = vsub.f32 %v1639_v2, %v1934_v17 }
 0xc9f   :  { %v1958_v20 = vmul.f32 %v4034_v15, %v4034_v15 }
 0xca0   :  { %v1957_v21 = vmul.f32 %v4036_v18, %v4036_v18  ;;  %v3051_v27 = vpop.f32.mrb[32].mxu0 }
 0xca1   :  { %v4042_v29 = vsub.f32 %v1642_v24, %v3051_v27  ;;  %v1944_v45 = vpop.f32.mrb[33].mxu0  ;;  %v3469_v24 = vld [vmem:[%s4130_s0] sm:$0xff] }
 0xca2   :  { %v3331_v38 = vpack.c.bf16 %v1958_v20, %v1957_v21  ;;  %v4044_v39 = vsub.f32 %v1641_v61, %v1944_v45 }
 0xca3   :  { %v1960_v58 = vmul.f32 %v4042_v29, %v4042_v29 }
 0xca4   :  { %v1959_v41 = vmul.f32 %v4044_v39, %v4044_v39  ;;  %3332 = vmatpush3.bf16.msra.mxu1 %v3331_v38 }
 0xca5   :  { %3333 = vmatprep.subr.bf16.mxu1 %v3598_v30 }
 0xca6   :  { %v3334_v42 = vpack.c.bf16 %v1960_v58, %v1959_v41 }
 0xca8   :  { %3335 = vmatpush3.bf16.msra.mxu1 %v3334_v42 }
 0xca9   :  { %3336 = vmatprep.subr.bf16.mxu1 %v3598_v30 }
 0xcab   :  { %3061 = vmatmul.mubr.msk.f32.vlgmr.msra.gmra.mrb[26].mxu1 %vm591_vm7, %v3782_v32 }
 0xcac   :  { %3338 = vmatpush3.bf16.msra.mxu1 %v3784_v33  ;;  %3095 = vmatprep.mubr.msk.f32.mxu1 %vm3599_vm0, %v3600_v31 }
 0xcad   :  { %3339 = vmatprep.subr.bf16.mxu1 %v3598_v30 }
 0xcb0   :  { %3341 = vmatpush3.bf16.msra.mxu1 %v3790_v37 }
 0xcb1   :  { %3342 = vmatprep.subr.bf16.mxu1 %v3598_v30 }
 0xcb4   :  { %3344 = vmatpush3.bf16.msra.mxu1 %v3796_v40 }
 0xcb5   :  { %3345 = vmatprep.subr.bf16.mxu1 %v3598_v30 }
 0xcb8   :  { %3347 = vmatpush3.bf16.msra.mxu1 %v3800_v43 }
 0xcb9   :  { %3348 = vmatprep.subr.bf16.mxu1 %v3598_v30 }
 0xcbc   :  { %3350 = vmatpush3.bf16.msra.mxu1 %v3804_v46 }
 0xcbd   :  { %3351 = vmatprep.subr.bf16.mxu1 %v3598_v30 }
 0xcc0   :  { %3353 = vmatpush3.bf16.msra.mxu1 %v3808_v49 }
 0xcc1   :  { %3354 = vmatprep.subr.bf16.mxu1 %v3598_v30 }
 0xcc4   :  { %3356 = vmatpush3.bf16.msra.mxu1 %v3812_v52 }
 0xcc5   :  { %3357 = vmatprep.subr.bf16.mxu1 %v3598_v30 }
 0xcc8   :  { %3359 = vmatpush3.bf16.msra.mxu1 %v3816_v55 }
 0xd7e   :  { %v2027_v31 = vpop.f32.mrb[26].mxu1 }
 0xd7f   :  { %v3062_v32 = vpop.f32.mrb[27].mxu1  ;;  %3096 = vmatmul.mubr.f32.vlgmr.msra.gmra.mrb[28].mxu1 %v2027_v31 }
 0xe52   :  { %v2097_v33 = vpop.f32.mrb[28].mxu1 }
 0xe53   :  { %v3097_v37 = vpop.f32.mrb[29].mxu1  ;;  %3098 = vmatprep.subr.mxu0 %v2097_v33 }
 0xe54   :  { %3099 = vmatpush3.msra.mxu0 %v2097_v33 }
 0xe55   :  { %3101 = vmatmul.mubr.msk.f32.vlgmr.msra.gmra.mrb[34].mxu0 %vm735_vm8, %v3862_v28  ;;  %3361 = vmatprep.subr.bf16.mxu0 %v3827_v62 }
 0xe56   :  { %3103 = vmatprep.mubr.msk.f32.mxu0 %vm735_vm8, %v3867_v35  ;;  %3363 = vmatpush3.bf16.msra.mxu0 %v3827_v62 }
 0xe57   :  { %3365 = vmatprep.subr.bf16.mxu0 %v3829_v0 }
 0xe59   :  { %3104 = vmatmul.mubr.msk.f32.gmra.mrb[36].mxu0 %vm735_vm8, %v3877_v36  ;;  %v2407_v36 = vld [vmem:[%s4133_s3 + $0x5] ss:$0 sm:$0xff] }
 0xe5a   :  { %3367 = vmatpush3.bf16.msra.mxu0 %v3829_v0 }
 0xe5b   :  { %3369 = vmatprep.subr.bf16.mxu0 %v3834_v5 }
 0xe5e   :  { %3371 = vmatpush3.bf16.msra.mxu0 %v3834_v5 }
 0xe5f   :  { %3373 = vmatprep.subr.bf16.mxu0 %v3838_v10 }
 0xe62   :  { %3375 = vmatpush3.bf16.msra.mxu0 %v3838_v10 }
 0xe63   :  { %3377 = vmatprep.subr.bf16.mxu0 %v3842_v13 }
 0xe66   :  { %3379 = vmatpush3.bf16.msra.mxu0 %v3842_v13 }
 0xe67   :  { %3381 = vmatprep.subr.bf16.mxu0 %v3846_v16 }
 0xe6a   :  { %3383 = vmatpush3.bf16.msra.mxu0 %v3846_v16 }
 0xe6b   :  { %3385 = vmatprep.subr.bf16.mxu0 %v3850_v19 }
 0xe6e   :  { %3387 = vmatpush3.bf16.msra.mxu0 %v3850_v19  ;;  %v2406_v19 = vld [vmem:[%s4133_s3 + $0x4] ss:$0 sm:$0xff] }
 0xe6f   :  { %3389 = vmatprep.subr.bf16.mxu0 %v3854_v25 }
 0xe72   :  { %3391 = vmatpush3.bf16.msra.mxu0 %v3854_v25 }
 0xf28   :  { %v3102_v30 = vpop.f32.mrb[34].mxu0 }
 0xf29   :  { %v2167_v40 = vpop.f32.mrb[35].mxu0 }
 0xf2a   :  { %3138 = vmatprep.mubr.f32.mxu0 %v2167_v40 }
 0xf2b   :  { %3139 = vmatmul.mubr.f32.vlgmr.msra.gmra.mrb[38].mxu0 %v3102_v30 }
 0xf2c   :  { %v3105_v43 = vpop.f32.mrb[36].mxu0 }
 0xf2d   :  { %v2177_v46 = vpop.f32.mrb[37].mxu0 }
 0xf2e   :  { %3141 = vmatprep.mubr.f32.mxu0 %v2177_v46 }
 0xf2f   :  { %3142 = vmatmul.mubr.f32.gmra.mrb[40].mxu0 %v3105_v43 }
 0xffe   :  { %v3140_v49 = vpop.f32.mrb[38].mxu0 }
 0xfff   :  { %v2258_v52 = vadd.f32 1e-05, %v3140_v49  ;;  %v2252_v55 = vpop.f32.mrb[39].mxu0 }
0x1000   :  { %v2253_v62 = vadd.f32 1e-05, %v2252_v55 }
0x1001   :  { %3460 = vrsqrt.f32 %v2258_v52 }
0x1002   :  { %3462 = vrsqrt.f32 %v2253_v62  ;;  %v3143_v0 = vpop.f32.mrb[40].mxu0 }
0x1003   :  { %v2268_v5 = vadd.f32 1e-05, %v3143_v0  ;;  %v2262_v10 = vpop.f32.mrb[41].mxu0 }
0x1004   :  { %v2263_v13 = vadd.f32 1e-05, %v2262_v10 }
0x1005   :  { %3464 = vrsqrt.f32 %v2268_v5 }
0x1006   :  { %3466 = vrsqrt.f32 %v2263_v13 }
0x100b   :  { %v3461_v16 = vpop.eup %3460 }
0x100c   :  { %v3463_v25 = vpop.eup %3462  ;;  %v2276_v28 = vmul.f32 %v3461_v16, %v4034_v15 }
0x100d   :  { %v2275_v35 = vmul.f32 %v3463_v25, %v4036_v18 }
0x100e   :  { %v2284_v48 = vmul.f32 %v2406_v19, %v2276_v28 }
0x100f   :  { %v3465_v44 = vpop.eup %3464  ;;  %v2283_v47 = vmul.f32 %v2406_v19, %v2275_v35 }
0x1010   :  { %v3467_v54 = vpop.eup %3466  ;;  %v2278_v59 = vmul.f32 %v3465_v44, %v4042_v29  ;;  %v2292_v51 = vadd.f32 %v2407_v36, %v2284_v48 }
0x1011   :  { %v2277_v53 = vmul.f32 %v3467_v54, %v4044_v39  ;;  %v2291_v56 = vadd.f32 %v2407_v36, %v2283_v47 }
0x1012   :  { %v2286_v50 = vmul.f32 %v2406_v19, %v2278_v59  ;;  %v2296_v57 = vmax.f32 %v2292_v51, 0.0 }
0x1013   :  { %v2285_v23 = vmul.f32 %v2406_v19, %v2277_v53  ;;  %v2295_v34 = vmax.f32 %v2291_v56, 0.0 }
0x1014   :  { %v2294_v1 = vadd.f32 %v2407_v36, %v2286_v50  ;;  %v2300_v2 = vadd.f32 %v3468_v22, %v2296_v57 }
0x1015   :  { %v2293_v60 = vadd.f32 %v2407_v36, %v2285_v23  ;;  %v2299_v26 = vadd.f32 %v3469_v24, %v2295_v34 }
0x1016   :  { %v2298_v61 = vmax.f32 %v2294_v1, 0.0  ;;  %v2304_v6 = vmax.f32 %v2300_v2, 0.0 }
0x1017   :  { %v2297_v9 = vmax.f32 %v2293_v60, 0.0  ;;  %v2303_v63 = vmax.f32 %v2299_v26, 0.0 }
0x1018   :  { %v2302_v4 = vadd.f32 %v3470_v3, %v2298_v61  ;;  %2308 = vst [vmem:[#allocation10 + $0x8] sm:$0xff] %v2304_v6 }
0x1019   :  { %v2301_v8 = vadd.f32 %v3471_v7, %v2297_v9  ;;  %2307 = vst [vmem:[#allocation10] sm:$0xff] %v2303_v63 }
0x101a   :  { %v2306_v11 = vmax.f32 %v2302_v4, 0.0 }
0x101b   :  { %v2305_v12 = vmax.f32 %v2301_v8, 0.0 }
0x101c   :  { %2310 = vst [vmem:[#allocation10 + $0x18] sm:$0xff] %v2306_v11 }
0x101d   :  { %2309 = vst [vmem:[#allocation10 + $0x10] sm:$0xff] %v2305_v12 }
0x101e   :  { %3571 = shalt.err (!%p3568_p8)
}
0x101f   :  { %s3572_s24 = scalar_lea.hbm %s4138_s8, 512 }
0x1020   :  { %p3573_p9 = scmp.ne.s32.totalorder %s4138_s8, %s3572_s24  ;;  %p3576_p10 = scmp.lt.u32.totalorder %s3572_s24, %s4138_s8 }
0x1022   :  { %p3578_p11 = pnand %p3576_p10, %p3573_p9 }
0x1024   :  { %3581 = shalt.err (!%p3578_p11)
}
0x1025   :  { %2322 = dma.vmem_to_hbm [thread:$0]  %s2317_s17, 512, %s4138_s8, [#allocation4], %s3595_s1, %s3595_s1, %s3596_s30  }
0x1026   :  { %3588 = dma.done.wait [#allocation4], 512  }
0x1027   :  { %3589 = vsyncadd [#allocation4], 4294966784 }
0x1028   :  { %2326 = vsyncpa [#allocation3], 1 }
0x1029   :  { %2327 = vsyncpa [#allocation6], 1 }
0x102a   :  { %2328 = vsyncpa [#allocation9], 1 }
0x102b   :  { %2329 = vsyncpa [#allocation4], 1 }

</bundles_post_ra>
